<compile_context>
chip_gen: v5e
topology: v5e:2x2
jax: 0.10.0
libtpu: 0.0.40
codegen_flags: <defaults>
</compile_context>

<pallas_src>
import functools

import jax
import jax.numpy as jnp
from jax import lax
from jax.experimental import pallas as pl
from jax.experimental.pallas import tpu as pltpu

# ---------------- static configuration (matches module __init__) -------------
B = 2          # batch
C = 32         # channels
T = 128        # sequence length
K = 3          # kernel_size
DILATIONS = (1, 3, 5)
RELU_SLOPE = 0.1   # h is None -> 0.1


def _leaky_relu(x, slope):
    return jnp.where(x > 0, x, slope * x)


def _resblock_kernel(x_ref, w1_ref, b1_ref, w2_ref, b2_ref, o_ref, *,
                     channels, seq_len, total_len, ksize, dilations, slope):
    """Fused 3x (lrelu -> dilated conv1d -> lrelu -> conv1d -> +residual).

    x_ref / o_ref : (C, B*T)  -- batch segments contiguous on the lane axis.
    w*_ref        : (3, C, K*C) fused-tap weights, flat col index = k*C + c_in.
    b*_ref        : (3, C, 1).
    """
    x = x_ref[...].astype(jnp.float32)                       # (C, B*T)

    # Within-segment time index of every lane (batch folded on lanes).
    tt = lax.broadcasted_iota(jnp.int32, (channels, total_len), 1) % seq_len

    # Build boundary masks once per distinct tap offset (reused across all
    # three residual iterations; conv2 always uses offsets {-1, 0, +1}).
    offsets = set()
    for d in tuple(dilations) + (1,):
        pad = d * (ksize - 1) // 2
        for k in range(ksize):
            off = k * d - pad
            if off != 0:
                offsets.add(off)
    masks = {off: (tt + off >= 0) & (tt + off < seq_len) for off in offsets}

    def conv1d(xin, w_ref, b_ref, i, dil):
        pad = dil * (ksize - 1) // 2
        cols = []
        for k in range(ksize):
            off = k * dil - pad                               # tap time offset
            if off == 0:
                cols.append(xin)
            else:
                # Circular lane rotation on the XLU; zero the wrapped lanes so
                # taps never read across the batch / sequence boundary.
                shifted = pltpu.roll(xin, (-off) % total_len, 1)
                cols.append(jnp.where(masks[off], shifted, 0.0))
        slab = jnp.concatenate(cols, axis=0)                  # (K*C, B*T)
        w = w_ref[i].astype(jnp.float32)                      # (C, K*C)
        y = jnp.dot(w, slab, preferred_element_type=jnp.float32)
        return y + b_ref[i].astype(jnp.float32)               # bias (C, 1)

    for i, dil in enumerate(dilations):
        xt = _leaky_relu(x, slope)
        xt = conv1d(xt, w1_ref, b1_ref, i, dil)
        xt = _leaky_relu(xt, slope)
        xt = conv1d(xt, w2_ref, b2_ref, i, 1)
        x = xt + x

    o_ref[...] = x.astype(o_ref.dtype)


def residual_block_pallas(x, w1, b1, w2, b2):
    """x: (B, C, T) f32.  w1/w2: (3, C_out, C_in, K) PyTorch conv layout.
    b1/b2: (3, C)."""
    batch, channels, seq_len = x.shape
    nb, c_out, c_in, ksize = w1.shape
    total_len = batch * seq_len

    # --- host-side layout plumbing (no kernel compute) ---
    # Batch folded onto the lane axis; weights packed into fused-tap slabs
    # (col index = k*C_in + c_in) so each conv is a single MXU matmul.
    x2d = jnp.transpose(x, (1, 0, 2)).reshape(channels, total_len)
    w1f = jnp.transpose(w1, (0, 1, 3, 2)).reshape(nb, c_out, ksize * c_in)
    w2f = jnp.transpose(w2, (0, 1, 3, 2)).reshape(nb, c_out, ksize * c_in)
    b1f = b1.reshape(nb, c_out, 1)
    b2f = b2.reshape(nb, c_out, 1)

    kernel = functools.partial(
        _resblock_kernel,
        channels=channels, seq_len=seq_len, total_len=total_len,
        ksize=ksize, dilations=DILATIONS, slope=RELU_SLOPE)

    # Single grid step: the whole problem fits in VMEM, avoiding per-step
    # pipeline overhead (~0.35 us/step) on 1-TC chips (v5e/v6e).
    # TODO(synk): on v7x (2 TCs) or production-length T, split the time axis
    # into a "parallel" grid dimension with a dil*(K-1) halo per block.
    out2d = pl.pallas_call(
        kernel,
        out_shape=jax.ShapeDtypeStruct((channels, total_len), x.dtype),
        grid=(1,),
        in_specs=[
            pl.BlockSpec((channels, total_len), lambda i: (0, 0)),
            pl.BlockSpec(w1f.shape, lambda i: (0, 0, 0)),
            pl.BlockSpec(b1f.shape, lambda i: (0, 0, 0)),
            pl.BlockSpec(w2f.shape, lambda i: (0, 0, 0)),
            pl.BlockSpec(b2f.shape, lambda i: (0, 0, 0)),
        ],
        out_specs=pl.BlockSpec((channels, total_len), lambda i: (0, 0)),
        compiler_params=pltpu.CompilerParams(
            dimension_semantics=("arbitrary",)),
    )(x2d, w1f, b1f, w2f, b2f)

    return jnp.transpose(out2d.reshape(channels, batch, seq_len), (1, 0, 2))


# ---------------- pure-JAX reference (for correctness check) -----------------
def _conv1d_ref(x, w_oik, bias, dil, ksize):
    # x: (B, C, T); w_oik: (C_out, C_in, K)
    pad = dil * (ksize - 1) // 2
    y = lax.conv_general_dilated(
        x, w_oik, window_strides=(1,), padding=[(pad, pad)],
        rhs_dilation=(dil,), dimension_numbers=("NCH", "OIH", "NCH"))
    return y + bias[None, :, None]


def residual_block_ref(x, w1, b1, w2, b2):
    ksize = w1.shape[-1]
    for i, dil in enumerate(DILATIONS):
        xt = jnp.where(x > 0, x, RELU_SLOPE * x)
        xt = _conv1d_ref(xt, w1[i], b1[i], dil, ksize)
        xt = jnp.where(xt > 0, xt, RELU_SLOPE * xt)
        xt = _conv1d_ref(xt, w2[i], b2[i], 1, ksize)
        x = xt + x
    return x


# ---------------- deterministic parameter construction -----------------------
def _make_weight_normed_conv(key):
    """Emulate weight_norm(Conv1d(C, C, K)) with init_weights(normal(0, 0.01)).
    Folded effective weight W = g * v / ||v||_(in,k) per output channel.
    Returns weight (C_out, C_in, K) and bias (C,)."""
    kv, kg, kb = jax.random.split(key, 3)
    v = 0.01 * jax.random.normal(kv, (C, C, K), jnp.float32)
    g = 1.0 + 0.1 * jax.random.normal(kg, (C, 1, 1), jnp.float32)
    norm = jnp.sqrt(jnp.sum(v * v, axis=(1, 2), keepdims=True)) + 1e-12
    w = g * v / norm
    bias = 0.01 * jax.random.normal(kb, (C,), jnp.float32)
    return w, bias


if __name__ == "__main__":
    root = jax.random.PRNGKey(0)
    kx, *wkeys = jax.random.split(root, 1 + 6)

    x = jax.random.normal(kx, (B, C, T), jnp.float32)

    w1_l, b1_l, w2_l, b2_l = [], [], [], []
    for i in range(3):
        w, b = _make_weight_normed_conv(wkeys[i])
        w1_l.append(w); b1_l.append(b)
        w, b = _make_weight_normed_conv(wkeys[3 + i])
        w2_l.append(w); b2_l.append(b)

    w1 = jnp.stack(w1_l)   # (3, C, C, K)
    b1 = jnp.stack(b1_l)   # (3, C)
    w2 = jnp.stack(w2_l)
    b2 = jnp.stack(b2_l)

    out = residual_block_pallas(x, w1, b1, w2, b2)
    out = jax.block_until_ready(out)

    ref = residual_block_ref(x, w1, b1, w2, b2)
    assert out.shape == (B, C, T)
    err = float(jnp.max(jnp.abs(out - ref)))
    assert jnp.allclose(out, ref, atol=1e-4, rtol=1e-4), err

    print("KERNEL_OK")
</pallas_src>

<mosaic_0001>
module attributes {stable_mosaic.version = 11 : i64} {
  func.func @_resblock_kernel(%arg0: i32, %arg1: memref<32x256xf32, #tpu.memory_space<vmem>>, %arg2: memref<3x32x96xf32, #tpu.memory_space<vmem>>, %arg3: memref<3x32x1xf32, #tpu.memory_space<vmem>>, %arg4: memref<3x32x96xf32, #tpu.memory_space<vmem>>, %arg5: memref<3x32x1xf32, #tpu.memory_space<vmem>>, %arg6: memref<32x256xf32, #tpu.memory_space<vmem>>) attributes {dimension_semantics = [#tpu.dimension_semantics<arbitrary>], iteration_bounds = array<i64: 1>, scalar_prefetch = 0 : i64, scratch_operands = 0 : i64, tpu.core_type = #tpu.core_type<tc>, window_params = [{pipeline_mode = #tpu.pipeline_mode<synchronous>, transform_indices = @transform_0, window_bounds = array<i64: 32, 256>}, {pipeline_mode = #tpu.pipeline_mode<synchronous>, transform_indices = @transform_1, window_bounds = array<i64: 3, 32, 96>}, {pipeline_mode = #tpu.pipeline_mode<synchronous>, transform_indices = @transform_2, window_bounds = array<i64: 3, 32, 1>}, {pipeline_mode = #tpu.pipeline_mode<synchronous>, transform_indices = @transform_3, window_bounds = array<i64: 3, 32, 96>}, {pipeline_mode = #tpu.pipeline_mode<synchronous>, transform_indices = @transform_4, window_bounds = array<i64: 3, 32, 1>}, {pipeline_mode = #tpu.pipeline_mode<synchronous>, transform_indices = @transform_5, window_bounds = array<i64: 32, 256>}]} {
    %c0 = arith.constant 0 : index
    %c0_0 = arith.constant 0 : index
    %0 = vector.load %arg1[%c0, %c0_0] : memref<32x256xf32, #tpu.memory_space<vmem>>, vector<32x256xf32>
    %1 = tpu.iota {dimensions = array<i32: 1>} : vector<32x256xi32>
    %c128_i32 = arith.constant 128 : i32
    %c0_i32 = arith.constant 0 : i32
    %2 = arith.cmpi eq, %c128_i32, %c0_i32 : i32
    %c1_i32 = arith.constant 1 : i32
    %3 = arith.select %2, %c1_i32, %c128_i32 : i32
    %4 = vector.broadcast %3 : i32 to vector<32x256xi32>
    %5 = arith.remsi %1, %4 : vector<32x256xi32>
    %c0_i32_1 = arith.constant 0 : i32
    %6 = vector.broadcast %c0_i32_1 : i32 to vector<32x256xi32>
    %7 = arith.cmpi ne, %5, %6 : vector<32x256xi32>
    %c0_i32_2 = arith.constant 0 : i32
    %8 = vector.broadcast %c0_i32_2 : i32 to vector<32x256xi32>
    %9 = arith.cmpi slt, %5, %8 : vector<32x256xi32>
    %c0_i32_3 = arith.constant 0 : i32
    %10 = arith.cmpi slt, %3, %c0_i32_3 : i32
    %11 = vector.broadcast %10 : i1 to vector<32x256xi1>
    %12 = vector.broadcast %11 : vector<32x256xi1> to vector<32x256xi1>
    %13 = arith.xori %9, %12 : vector<32x256xi1>
    %14 = arith.andi %13, %7 : vector<32x256xi1>
    %15 = vector.broadcast %3 : i32 to vector<32x256xi32>
    %16 = arith.addi %5, %15 : vector<32x256xi32>
    %17 = arith.select %14, %16, %5 : vector<32x256xi1>, vector<32x256xi32>
    %c1_i32_4 = arith.constant 1 : i32
    %18 = vector.broadcast %c1_i32_4 : i32 to vector<32x256xi32>
    %19 = arith.addi %17, %18 : vector<32x256xi32>
    %c0_i32_5 = arith.constant 0 : i32
    %20 = vector.broadcast %c0_i32_5 : i32 to vector<32x256xi32>
    %21 = arith.cmpi sge, %19, %20 : vector<32x256xi32>
    %c1_i32_6 = arith.constant 1 : i32
    %22 = vector.broadcast %c1_i32_6 : i32 to vector<32x256xi32>
    %23 = arith.addi %17, %22 : vector<32x256xi32>
    %c128_i32_7 = arith.constant 128 : i32
    %24 = vector.broadcast %c128_i32_7 : i32 to vector<32x256xi32>
    %25 = arith.cmpi slt, %23, %24 : vector<32x256xi32>
    %26 = arith.andi %21, %25 : vector<32x256xi1>
    %c3_i32 = arith.constant 3 : i32
    %27 = vector.broadcast %c3_i32 : i32 to vector<32x256xi32>
    %28 = arith.addi %17, %27 : vector<32x256xi32>
    %c0_i32_8 = arith.constant 0 : i32
    %29 = vector.broadcast %c0_i32_8 : i32 to vector<32x256xi32>
    %30 = arith.cmpi sge, %28, %29 : vector<32x256xi32>
    %c3_i32_9 = arith.constant 3 : i32
    %31 = vector.broadcast %c3_i32_9 : i32 to vector<32x256xi32>
    %32 = arith.addi %17, %31 : vector<32x256xi32>
    %c128_i32_10 = arith.constant 128 : i32
    %33 = vector.broadcast %c128_i32_10 : i32 to vector<32x256xi32>
    %34 = arith.cmpi slt, %32, %33 : vector<32x256xi32>
    %35 = arith.andi %30, %34 : vector<32x256xi1>
    %c5_i32 = arith.constant 5 : i32
    %36 = vector.broadcast %c5_i32 : i32 to vector<32x256xi32>
    %37 = arith.addi %17, %36 : vector<32x256xi32>
    %c0_i32_11 = arith.constant 0 : i32
    %38 = vector.broadcast %c0_i32_11 : i32 to vector<32x256xi32>
    %39 = arith.cmpi sge, %37, %38 : vector<32x256xi32>
    %c5_i32_12 = arith.constant 5 : i32
    %40 = vector.broadcast %c5_i32_12 : i32 to vector<32x256xi32>
    %41 = arith.addi %17, %40 : vector<32x256xi32>
    %c128_i32_13 = arith.constant 128 : i32
    %42 = vector.broadcast %c128_i32_13 : i32 to vector<32x256xi32>
    %43 = arith.cmpi slt, %41, %42 : vector<32x256xi32>
    %44 = arith.andi %39, %43 : vector<32x256xi1>
    %c-5_i32 = arith.constant -5 : i32
    %45 = vector.broadcast %c-5_i32 : i32 to vector<32x256xi32>
    %46 = arith.addi %17, %45 : vector<32x256xi32>
    %c0_i32_14 = arith.constant 0 : i32
    %47 = vector.broadcast %c0_i32_14 : i32 to vector<32x256xi32>
    %48 = arith.cmpi sge, %46, %47 : vector<32x256xi32>
    %c-5_i32_15 = arith.constant -5 : i32
    %49 = vector.broadcast %c-5_i32_15 : i32 to vector<32x256xi32>
    %50 = arith.addi %17, %49 : vector<32x256xi32>
    %c128_i32_16 = arith.constant 128 : i32
    %51 = vector.broadcast %c128_i32_16 : i32 to vector<32x256xi32>
    %52 = arith.cmpi slt, %50, %51 : vector<32x256xi32>
    %53 = arith.andi %48, %52 : vector<32x256xi1>
    %c-3_i32 = arith.constant -3 : i32
    %54 = vector.broadcast %c-3_i32 : i32 to vector<32x256xi32>
    %55 = arith.addi %17, %54 : vector<32x256xi32>
    %c0_i32_17 = arith.constant 0 : i32
    %56 = vector.broadcast %c0_i32_17 : i32 to vector<32x256xi32>
    %57 = arith.cmpi sge, %55, %56 : vector<32x256xi32>
    %c-3_i32_18 = arith.constant -3 : i32
    %58 = vector.broadcast %c-3_i32_18 : i32 to vector<32x256xi32>
    %59 = arith.addi %17, %58 : vector<32x256xi32>
    %c128_i32_19 = arith.constant 128 : i32
    %60 = vector.broadcast %c128_i32_19 : i32 to vector<32x256xi32>
    %61 = arith.cmpi slt, %59, %60 : vector<32x256xi32>
    %62 = arith.andi %57, %61 : vector<32x256xi1>
    %c-1_i32 = arith.constant -1 : i32
    %63 = vector.broadcast %c-1_i32 : i32 to vector<32x256xi32>
    %64 = arith.addi %17, %63 : vector<32x256xi32>
    %c0_i32_20 = arith.constant 0 : i32
    %65 = vector.broadcast %c0_i32_20 : i32 to vector<32x256xi32>
    %66 = arith.cmpi sge, %64, %65 : vector<32x256xi32>
    %c-1_i32_21 = arith.constant -1 : i32
    %67 = vector.broadcast %c-1_i32_21 : i32 to vector<32x256xi32>
    %68 = arith.addi %17, %67 : vector<32x256xi32>
    %c128_i32_22 = arith.constant 128 : i32
    %69 = vector.broadcast %c128_i32_22 : i32 to vector<32x256xi32>
    %70 = arith.cmpi slt, %68, %69 : vector<32x256xi32>
    %71 = arith.andi %66, %70 : vector<32x256xi1>
    %cst = arith.constant 0.000000e+00 : f32
    %72 = vector.broadcast %cst : f32 to vector<32x256xf32>
    %73 = arith.cmpf ogt, %0, %72 : vector<32x256xf32>
    %cst_23 = arith.constant 1.000000e-01 : f32
    %74 = vector.broadcast %cst_23 : f32 to vector<32x256xf32>
    %75 = arith.mulf %74, %0 : vector<32x256xf32>
    %76 = arith.select %73, %0, %75 : vector<32x256xi1>, vector<32x256xf32>
    %c1_i32_24 = arith.constant 1 : i32
    %77 = tpu.dynamic_rotate %76 by %c1_i32_24 dim 1 : vector<32x256xf32>, i32 -> vector<32x256xf32>
    %cst_25 = arith.constant 0.000000e+00 : f32
    %78 = vector.broadcast %cst_25 : f32 to vector<32x256xf32>
    %79 = arith.select %71, %77, %78 : vector<32x256xi1>, vector<32x256xf32>
    %c255_i32 = arith.constant 255 : i32
    %80 = tpu.dynamic_rotate %76 by %c255_i32 dim 1 : vector<32x256xf32>, i32 -> vector<32x256xf32>
    %cst_26 = arith.constant 0.000000e+00 : f32
    %81 = vector.broadcast %cst_26 : f32 to vector<32x256xf32>
    %82 = arith.select %26, %80, %81 : vector<32x256xi1>, vector<32x256xf32>
    %83 = tpu.concatenate %79, %76, %82 in 0 : vector<32x256xf32>, vector<32x256xf32>, vector<32x256xf32> -> vector<96x256xf32>
    %c0_27 = arith.constant 0 : index
    %c0_28 = arith.constant 0 : index
    %c0_29 = arith.constant 0 : index
    %84 = vector.load %arg2[%c0_27, %c0_28, %c0_29] : memref<3x32x96xf32, #tpu.memory_space<vmem>>, vector<1x32x96xf32>
    %85 = vector.shape_cast %84 : vector<1x32x96xf32> to vector<32x96xf32>
    %cst_30 = arith.constant dense<0.000000e+00> : vector<32x256xf32>
    %86 = tpu.matmul %85, %83, %cst_30 {dimension_numbers = #tpu.dot_dimension_numbers<[1], [0], [0], [1], [0, 0, 1, 1], [], []>} : vector<32x96xf32>, vector<96x256xf32>, vector<32x256xf32> -> vector<32x256xf32>
    %c0_31 = arith.constant 0 : index
    %c0_32 = arith.constant 0 : index
    %c0_33 = arith.constant 0 : index
    %87 = vector.load %arg3[%c0_31, %c0_32, %c0_33] : memref<3x32x1xf32, #tpu.memory_space<vmem>>, vector<1x32x1xf32>
    %88 = vector.shape_cast %87 : vector<1x32x1xf32> to vector<32x1xf32>
    %89 = vector.broadcast %88 : vector<32x1xf32> to vector<32x256xf32>
    %90 = arith.addf %86, %89 : vector<32x256xf32>
    %cst_34 = arith.constant 0.000000e+00 : f32
    %91 = vector.broadcast %cst_34 : f32 to vector<32x256xf32>
    %92 = arith.cmpf ogt, %90, %91 : vector<32x256xf32>
    %cst_35 = arith.constant 1.000000e-01 : f32
    %93 = vector.broadcast %cst_35 : f32 to vector<32x256xf32>
    %94 = arith.mulf %93, %90 : vector<32x256xf32>
    %95 = arith.select %92, %90, %94 : vector<32x256xi1>, vector<32x256xf32>
    %c1_i32_36 = arith.constant 1 : i32
    %96 = tpu.dynamic_rotate %95 by %c1_i32_36 dim 1 : vector<32x256xf32>, i32 -> vector<32x256xf32>
    %cst_37 = arith.constant 0.000000e+00 : f32
    %97 = vector.broadcast %cst_37 : f32 to vector<32x256xf32>
    %98 = arith.select %71, %96, %97 : vector<32x256xi1>, vector<32x256xf32>
    %c255_i32_38 = arith.constant 255 : i32
    %99 = tpu.dynamic_rotate %95 by %c255_i32_38 dim 1 : vector<32x256xf32>, i32 -> vector<32x256xf32>
    %cst_39 = arith.constant 0.000000e+00 : f32
    %100 = vector.broadcast %cst_39 : f32 to vector<32x256xf32>
    %101 = arith.select %26, %99, %100 : vector<32x256xi1>, vector<32x256xf32>
    %102 = tpu.concatenate %98, %95, %101 in 0 : vector<32x256xf32>, vector<32x256xf32>, vector<32x256xf32> -> vector<96x256xf32>
    %c0_40 = arith.constant 0 : index
    %c0_41 = arith.constant 0 : index
    %c0_42 = arith.constant 0 : index
    %103 = vector.load %arg4[%c0_40, %c0_41, %c0_42] : memref<3x32x96xf32, #tpu.memory_space<vmem>>, vector<1x32x96xf32>
    %104 = vector.shape_cast %103 : vector<1x32x96xf32> to vector<32x96xf32>
    %cst_43 = arith.constant dense<0.000000e+00> : vector<32x256xf32>
    %105 = tpu.matmul %104, %102, %cst_43 {dimension_numbers = #tpu.dot_dimension_numbers<[1], [0], [0], [1], [0, 0, 1, 1], [], []>} : vector<32x96xf32>, vector<96x256xf32>, vector<32x256xf32> -> vector<32x256xf32>
    %c0_44 = arith.constant 0 : index
    %c0_45 = arith.constant 0 : index
    %c0_46 = arith.constant 0 : index
    %106 = vector.load %arg5[%c0_44, %c0_45, %c0_46] : memref<3x32x1xf32, #tpu.memory_space<vmem>>, vector<1x32x1xf32>
    %107 = vector.shape_cast %106 : vector<1x32x1xf32> to vector<32x1xf32>
    %108 = vector.broadcast %107 : vector<32x1xf32> to vector<32x256xf32>
    %109 = arith.addf %105, %108 : vector<32x256xf32>
    %110 = arith.addf %109, %0 : vector<32x256xf32>
    %cst_47 = arith.constant 0.000000e+00 : f32
    %111 = vector.broadcast %cst_47 : f32 to vector<32x256xf32>
    %112 = arith.cmpf ogt, %110, %111 : vector<32x256xf32>
    %cst_48 = arith.constant 1.000000e-01 : f32
    %113 = vector.broadcast %cst_48 : f32 to vector<32x256xf32>
    %114 = arith.mulf %113, %110 : vector<32x256xf32>
    %115 = arith.select %112, %110, %114 : vector<32x256xi1>, vector<32x256xf32>
    %c3_i32_49 = arith.constant 3 : i32
    %116 = tpu.dynamic_rotate %115 by %c3_i32_49 dim 1 : vector<32x256xf32>, i32 -> vector<32x256xf32>
    %cst_50 = arith.constant 0.000000e+00 : f32
    %117 = vector.broadcast %cst_50 : f32 to vector<32x256xf32>
    %118 = arith.select %62, %116, %117 : vector<32x256xi1>, vector<32x256xf32>
    %c253_i32 = arith.constant 253 : i32
    %119 = tpu.dynamic_rotate %115 by %c253_i32 dim 1 : vector<32x256xf32>, i32 -> vector<32x256xf32>
    %cst_51 = arith.constant 0.000000e+00 : f32
    %120 = vector.broadcast %cst_51 : f32 to vector<32x256xf32>
    %121 = arith.select %35, %119, %120 : vector<32x256xi1>, vector<32x256xf32>
    %122 = tpu.concatenate %118, %115, %121 in 0 : vector<32x256xf32>, vector<32x256xf32>, vector<32x256xf32> -> vector<96x256xf32>
    %c1 = arith.constant 1 : index
    %c0_52 = arith.constant 0 : index
    %c0_53 = arith.constant 0 : index
    %123 = vector.load %arg2[%c1, %c0_52, %c0_53] : memref<3x32x96xf32, #tpu.memory_space<vmem>>, vector<1x32x96xf32>
    %124 = vector.shape_cast %123 : vector<1x32x96xf32> to vector<32x96xf32>
    %cst_54 = arith.constant dense<0.000000e+00> : vector<32x256xf32>
    %125 = tpu.matmul %124, %122, %cst_54 {dimension_numbers = #tpu.dot_dimension_numbers<[1], [0], [0], [1], [0, 0, 1, 1], [], []>} : vector<32x96xf32>, vector<96x256xf32>, vector<32x256xf32> -> vector<32x256xf32>
    %c1_55 = arith.constant 1 : index
    %c0_56 = arith.constant 0 : index
    %c0_57 = arith.constant 0 : index
    %126 = vector.load %arg3[%c1_55, %c0_56, %c0_57] : memref<3x32x1xf32, #tpu.memory_space<vmem>>, vector<1x32x1xf32>
    %127 = vector.shape_cast %126 : vector<1x32x1xf32> to vector<32x1xf32>
    %128 = vector.broadcast %127 : vector<32x1xf32> to vector<32x256xf32>
    %129 = arith.addf %125, %128 : vector<32x256xf32>
    %cst_58 = arith.constant 0.000000e+00 : f32
    %130 = vector.broadcast %cst_58 : f32 to vector<32x256xf32>
    %131 = arith.cmpf ogt, %129, %130 : vector<32x256xf32>
    %cst_59 = arith.constant 1.000000e-01 : f32
    %132 = vector.broadcast %cst_59 : f32 to vector<32x256xf32>
    %133 = arith.mulf %132, %129 : vector<32x256xf32>
    %134 = arith.select %131, %129, %133 : vector<32x256xi1>, vector<32x256xf32>
    %c1_i32_60 = arith.constant 1 : i32
    %135 = tpu.dynamic_rotate %134 by %c1_i32_60 dim 1 : vector<32x256xf32>, i32 -> vector<32x256xf32>
    %cst_61 = arith.constant 0.000000e+00 : f32
    %136 = vector.broadcast %cst_61 : f32 to vector<32x256xf32>
    %137 = arith.select %71, %135, %136 : vector<32x256xi1>, vector<32x256xf32>
    %c255_i32_62 = arith.constant 255 : i32
    %138 = tpu.dynamic_rotate %134 by %c255_i32_62 dim 1 : vector<32x256xf32>, i32 -> vector<32x256xf32>
    %cst_63 = arith.constant 0.000000e+00 : f32
    %139 = vector.broadcast %cst_63 : f32 to vector<32x256xf32>
    %140 = arith.select %26, %138, %139 : vector<32x256xi1>, vector<32x256xf32>
    %141 = tpu.concatenate %137, %134, %140 in 0 : vector<32x256xf32>, vector<32x256xf32>, vector<32x256xf32> -> vector<96x256xf32>
    %c1_64 = arith.constant 1 : index
    %c0_65 = arith.constant 0 : index
    %c0_66 = arith.constant 0 : index
    %142 = vector.load %arg4[%c1_64, %c0_65, %c0_66] : memref<3x32x96xf32, #tpu.memory_space<vmem>>, vector<1x32x96xf32>
    %143 = vector.shape_cast %142 : vector<1x32x96xf32> to vector<32x96xf32>
    %cst_67 = arith.constant dense<0.000000e+00> : vector<32x256xf32>
    %144 = tpu.matmul %143, %141, %cst_67 {dimension_numbers = #tpu.dot_dimension_numbers<[1], [0], [0], [1], [0, 0, 1, 1], [], []>} : vector<32x96xf32>, vector<96x256xf32>, vector<32x256xf32> -> vector<32x256xf32>
    %c1_68 = arith.constant 1 : index
    %c0_69 = arith.constant 0 : index
    %c0_70 = arith.constant 0 : index
    %145 = vector.load %arg5[%c1_68, %c0_69, %c0_70] : memref<3x32x1xf32, #tpu.memory_space<vmem>>, vector<1x32x1xf32>
    %146 = vector.shape_cast %145 : vector<1x32x1xf32> to vector<32x1xf32>
    %147 = vector.broadcast %146 : vector<32x1xf32> to vector<32x256xf32>
    %148 = arith.addf %144, %147 : vector<32x256xf32>
    %149 = arith.addf %148, %110 : vector<32x256xf32>
    %cst_71 = arith.constant 0.000000e+00 : f32
    %150 = vector.broadcast %cst_71 : f32 to vector<32x256xf32>
    %151 = arith.cmpf ogt, %149, %150 : vector<32x256xf32>
    %cst_72 = arith.constant 1.000000e-01 : f32
    %152 = vector.broadcast %cst_72 : f32 to vector<32x256xf32>
    %153 = arith.mulf %152, %149 : vector<32x256xf32>
    %154 = arith.select %151, %149, %153 : vector<32x256xi1>, vector<32x256xf32>
    %c5_i32_73 = arith.constant 5 : i32
    %155 = tpu.dynamic_rotate %154 by %c5_i32_73 dim 1 : vector<32x256xf32>, i32 -> vector<32x256xf32>
    %cst_74 = arith.constant 0.000000e+00 : f32
    %156 = vector.broadcast %cst_74 : f32 to vector<32x256xf32>
    %157 = arith.select %53, %155, %156 : vector<32x256xi1>, vector<32x256xf32>
    %c251_i32 = arith.constant 251 : i32
    %158 = tpu.dynamic_rotate %154 by %c251_i32 dim 1 : vector<32x256xf32>, i32 -> vector<32x256xf32>
    %cst_75 = arith.constant 0.000000e+00 : f32
    %159 = vector.broadcast %cst_75 : f32 to vector<32x256xf32>
    %160 = arith.select %44, %158, %159 : vector<32x256xi1>, vector<32x256xf32>
    %161 = tpu.concatenate %157, %154, %160 in 0 : vector<32x256xf32>, vector<32x256xf32>, vector<32x256xf32> -> vector<96x256xf32>
    %c2 = arith.constant 2 : index
    %c0_76 = arith.constant 0 : index
    %c0_77 = arith.constant 0 : index
    %162 = vector.load %arg2[%c2, %c0_76, %c0_77] : memref<3x32x96xf32, #tpu.memory_space<vmem>>, vector<1x32x96xf32>
    %163 = vector.shape_cast %162 : vector<1x32x96xf32> to vector<32x96xf32>
    %cst_78 = arith.constant dense<0.000000e+00> : vector<32x256xf32>
    %164 = tpu.matmul %163, %161, %cst_78 {dimension_numbers = #tpu.dot_dimension_numbers<[1], [0], [0], [1], [0, 0, 1, 1], [], []>} : vector<32x96xf32>, vector<96x256xf32>, vector<32x256xf32> -> vector<32x256xf32>
    %c2_79 = arith.constant 2 : index
    %c0_80 = arith.constant 0 : index
    %c0_81 = arith.constant 0 : index
    %165 = vector.load %arg3[%c2_79, %c0_80, %c0_81] : memref<3x32x1xf32, #tpu.memory_space<vmem>>, vector<1x32x1xf32>
    %166 = vector.shape_cast %165 : vector<1x32x1xf32> to vector<32x1xf32>
    %167 = vector.broadcast %166 : vector<32x1xf32> to vector<32x256xf32>
    %168 = arith.addf %164, %167 : vector<32x256xf32>
    %cst_82 = arith.constant 0.000000e+00 : f32
    %169 = vector.broadcast %cst_82 : f32 to vector<32x256xf32>
    %170 = arith.cmpf ogt, %168, %169 : vector<32x256xf32>
    %cst_83 = arith.constant 1.000000e-01 : f32
    %171 = vector.broadcast %cst_83 : f32 to vector<32x256xf32>
    %172 = arith.mulf %171, %168 : vector<32x256xf32>
    %173 = arith.select %170, %168, %172 : vector<32x256xi1>, vector<32x256xf32>
    %c1_i32_84 = arith.constant 1 : i32
    %174 = tpu.dynamic_rotate %173 by %c1_i32_84 dim 1 : vector<32x256xf32>, i32 -> vector<32x256xf32>
    %cst_85 = arith.constant 0.000000e+00 : f32
    %175 = vector.broadcast %cst_85 : f32 to vector<32x256xf32>
    %176 = arith.select %71, %174, %175 : vector<32x256xi1>, vector<32x256xf32>
    %c255_i32_86 = arith.constant 255 : i32
    %177 = tpu.dynamic_rotate %173 by %c255_i32_86 dim 1 : vector<32x256xf32>, i32 -> vector<32x256xf32>
    %cst_87 = arith.constant 0.000000e+00 : f32
    %178 = vector.broadcast %cst_87 : f32 to vector<32x256xf32>
    %179 = arith.select %26, %177, %178 : vector<32x256xi1>, vector<32x256xf32>
    %180 = tpu.concatenate %176, %173, %179 in 0 : vector<32x256xf32>, vector<32x256xf32>, vector<32x256xf32> -> vector<96x256xf32>
    %c2_88 = arith.constant 2 : index
    %c0_89 = arith.constant 0 : index
    %c0_90 = arith.constant 0 : index
    %181 = vector.load %arg4[%c2_88, %c0_89, %c0_90] : memref<3x32x96xf32, #tpu.memory_space<vmem>>, vector<1x32x96xf32>
    %182 = vector.shape_cast %181 : vector<1x32x96xf32> to vector<32x96xf32>
    %cst_91 = arith.constant dense<0.000000e+00> : vector<32x256xf32>
    %183 = tpu.matmul %182, %180, %cst_91 {dimension_numbers = #tpu.dot_dimension_numbers<[1], [0], [0], [1], [0, 0, 1, 1], [], []>} : vector<32x96xf32>, vector<96x256xf32>, vector<32x256xf32> -> vector<32x256xf32>
    %c2_92 = arith.constant 2 : index
    %c0_93 = arith.constant 0 : index
    %c0_94 = arith.constant 0 : index
    %184 = vector.load %arg5[%c2_92, %c0_93, %c0_94] : memref<3x32x1xf32, #tpu.memory_space<vmem>>, vector<1x32x1xf32>
    %185 = vector.shape_cast %184 : vector<1x32x1xf32> to vector<32x1xf32>
    %186 = vector.broadcast %185 : vector<32x1xf32> to vector<32x256xf32>
    %187 = arith.addf %183, %186 : vector<32x256xf32>
    %188 = arith.addf %187, %149 : vector<32x256xf32>
    %c0_95 = arith.constant 0 : index
    %c0_96 = arith.constant 0 : index
    %189 = vector.load %arg6[%c0_95, %c0_96] : memref<32x256xf32, #tpu.memory_space<vmem>>, vector<32x256xf32>
    tpu.vector_store %arg6[%c0_95, %c0_96], %188 {strides = array<i32>} : memref<32x256xf32, #tpu.memory_space<vmem>>, vector<32x256xf32>,
    return
  }
  func.func @transform_0(%arg0: i32) -> (i32, i32) {
    %c0_i32 = arith.constant 0 : i32
    %c0_i32_0 = arith.constant 0 : i32
    %c0_i32_1 = arith.constant 0 : i32
    return %c0_i32, %c0_i32_0 : i32, i32
  }
  func.func @transform_1(%arg0: i32) -> (i32, i32, i32) {
    %c0_i32 = arith.constant 0 : i32
    %c0_i32_0 = arith.constant 0 : i32
    %c0_i32_1 = arith.constant 0 : i32
    %c0_i32_2 = arith.constant 0 : i32
    return %c0_i32, %c0_i32_0, %c0_i32_1 : i32, i32, i32
  }
  func.func @transform_2(%arg0: i32) -> (i32, i32, i32) {
    %c0_i32 = arith.constant 0 : i32
    %c0_i32_0 = arith.constant 0 : i32
    %c0_i32_1 = arith.constant 0 : i32
    %c0_i32_2 = arith.constant 0 : i32
    return %c0_i32, %c0_i32_0, %c0_i32_1 : i32, i32, i32
  }
  func.func @transform_3(%arg0: i32) -> (i32, i32, i32) {
    %c0_i32 = arith.constant 0 : i32
    %c0_i32_0 = arith.constant 0 : i32
    %c0_i32_1 = arith.constant 0 : i32
    %c0_i32_2 = arith.constant 0 : i32
    return %c0_i32, %c0_i32_0, %c0_i32_1 : i32, i32, i32
  }
  func.func @transform_4(%arg0: i32) -> (i32, i32, i32) {
    %c0_i32 = arith.constant 0 : i32
    %c0_i32_0 = arith.constant 0 : i32
    %c0_i32_1 = arith.constant 0 : i32
    %c0_i32_2 = arith.constant 0 : i32
    return %c0_i32, %c0_i32_0, %c0_i32_1 : i32, i32, i32
  }
  func.func @transform_5(%arg0: i32) -> (i32, i32) {
    %c0_i32 = arith.constant 0 : i32
    %c0_i32_0 = arith.constant 0 : i32
    %c0_i32_1 = arith.constant 0 : i32
    return %c0_i32, %c0_i32_0 : i32, i32
  }
}

</mosaic_0001>

<bundles_post_ra>
// kernel: tpu_custom_call.1
= control target key start
LH: loop header
LB: loop body
LE: loop exit
PB: predicated region body
PF: predicated region fallthrough
CT: control target
= control target key end

     0   :  { %10 = vsyncpa [#allocation3], 0  ;;  %s2565_s0 = inlined_call_operand.hbm [shape: f32[32,256], index: 0, kind: input, shape index: {}]   ;;  %s2566_s1 = inlined_call_operand.vmem [shape: f32[3,32,96], index: 1, kind: input, shape index: {}]   ;;  %s2567_s2 = inlined_call_operand.vmem [shape: f32[3,32,1], index: 2, kind: input, shape index: {}]   ;;  %s2568_s3 = inlined_call_operand.vmem [shape: f32[3,32,96], index: 3, kind: input, shape index: {}]   ;;  %s2569_s4 = inlined_call_operand.vmem [shape: f32[3,32,1], index: 4, kind: input, shape index: {}]   ;;  %s2570_s5 = inlined_call_operand.hbm [shape: f32[32,256], index: 5, kind: output, shape index: {}]  }
   0x1   :  { %11 = vsyncpa [#allocation4], 0  ;;  %s16_s20 = sshll.u32 %s2565_s0, 4  ;;  %s1544_s21 = smov [#allocation2]   ;;  %s17_s20 = int_to_ptr.hbm [resolvable:$true] %s16_s20 }
   0x2   :  { %s18_s22 = sshll.u32 %s1544_s21, 4  ;;  %s1545_s23 = smov 256   ;;  %s19_s22 = int_to_ptr.vmem [resolvable:$true] %s18_s22 }
   0x3   :  { %s1546_s24 = smov 16  }
   0x4   :  { %24 = dma.hbm_to_vmem [thread:$0]  %s17_s20, 1024, %s19_s22, [#allocation3], %s1545_s23, %s1545_s23, %s1546_s24  }
   0x5   :  { %1540 = dma.done.wait [#allocation3], 1024  }
   0x6   :  { %1541 = vsyncadd [#allocation3], 4294966272  ;;  %v1591_v0 = vld [vmem:[#allocation2 + $0x30] sm:$0xff]  ;;  %v1593_v1 = vld [vmem:[#allocation2 + $0x20] sm:$0xff]  ;;  %s1547_s0 = smov 127   ;;  %s1548_s25 = smov 1   ;;  %v45_v24 = vlaneseq }
   0x7   :  { %v1595_v2 = vld [vmem:[#allocation2 + $0x38] sm:$0xff]  ;;  %vm126_vm0 = vcmp.gt.f32.partialorder %v1591_v0, 0.0  ;;  %v134_v3 = vmul.f32 0.1, %v1591_v0  ;;  %vm124_vm1 = vcmp.gt.f32.partialorder %v1593_v1, 0.0  ;;  %v1601_v5 = vld [vmem:[#allocation2 + $0x28] sm:$0xff] }
   0x8   :  { %v132_v4 = vmul.f32 0.1, %v1593_v1  ;;  %v1609_v8 = vld [vmem:[#allocation2 + $0x10] sm:$0xff]  ;;  %v135_v9 = vmul.f32 0.1, %v1595_v2  ;;  %vm127_vm3 = vcmp.gt.f32.partialorder %v1595_v2, 0.0 }
   0x9   :  { %v1604_v6 = vsel %vm126_vm0, %v1591_v0, %v134_v3  ;;  %v133_v10 = vmul.f32 0.1, %v1601_v5  ;;  %vm122_vm2 = vcmp.gt.f32.partialorder %v1609_v8, 0.0  ;;  %v130_v11 = vmul.f32 0.1, %v1609_v8  ;;  %v1621_v12 = vld [vmem:[#allocation2 + $0x18] sm:$0xff] }
   0xa   :  { %v1607_v7 = vsel %vm124_vm1, %v1593_v1, %v132_v4  ;;  %183 = vrot.lane.b32.xlu0 %v1604_v6, %s1547_s0  ;;  %vm125_vm4 = vcmp.gt.f32.partialorder %v1601_v5, 0.0  ;;  %v1629_v14 = vsel %vm127_vm3, %v1595_v2, %v135_v9  ;;  %v131_v16 = vmul.f32 0.1, %v1621_v12  ;;  %v1635_v17 = vld [vmem:[#allocation2 + $0x8] sm:$0xff]  ;;  %v1637_v18 = vld [vmem:[#allocation2] sm:$0xff]  ;;  %v217_v40 = vld [vmem:[%s2567_s2 + $0x18] sm:$0xff] }
   0xb   :  { %181 = vrot.lane.b32.xlu1 %v1607_v7, %s1547_s0  ;;  %v1624_v13 = vsel %vm122_vm2, %v1609_v8, %v130_v11  ;;  %v1632_v15 = vsel %vm125_vm4, %v1601_v5, %v133_v10  ;;  %vm123_vm5 = vcmp.gt.f32.partialorder %v1621_v12, 0.0  ;;  %v129_v19 = vmul.f32 0.1, %v1635_v17  ;;  %v214_v49 = vld [vmem:[%s2567_s2] sm:$0xff]  ;;  %v215_v59 = vld [vmem:[%s2567_s2 + $0x8] sm:$0xff]  ;;  %v216_v3 = vld [vmem:[%s2567_s2 + $0x10] sm:$0xff] }
   0xc   :  { %179 = vrot.lane.b32.xlu2 %v1624_v13, %s1547_s0  ;;  %v128_v20 = vmul.f32 0.1, %v1637_v18  ;;  %v1647_v21 = vsel %vm123_vm5, %v1621_v12, %v131_v16  ;;  %vm121_vm6 = vcmp.gt.f32.partialorder %v1635_v17, 0.0  ;;  %vm120_vm7 = vcmp.gt.f32.partialorder %v1637_v18, 0.0  ;;  %v211_v11 = vld [vmem:[%s2566_s1 + $0x8] sm:$0xff]  ;;  %s1550_s11 = smov 125  }
   0xd   :  { %v1654_v22 = vsel %vm121_vm6, %v1635_v17, %v129_v19  ;;  %v1679_v25 = vand.u32 127, %v45_v24  ;;  %v1549_v44 = vmov 0   ;;  %vm238_vm14 = vcmask 785408   ;;  %s1551_s12 = smov 3   ;;  %s1552_s26 = smov 123  }
   0xe   :  { %v1657_v23 = vsel %vm120_vm7, %v1637_v18, %v128_v20  ;;  %1489 = vset.pattern.permute.xlu1 %v1549_v44  ;;  %1491 = vset.pattern.permute.xlu0 %v1549_v44  ;;  %s1553_s27 = smov 5  }
   0xf   :  { %v47_v27 = vadd.s32 128, %v1679_v25  ;;  %v1685_v31 = vadd.s32 1, %v1679_v25  ;;  %vm193_vm8 = vcmp.lt.s32.totalorder %v1679_v25, 127  ;;  %1490 = vset.pattern.permute.xlu2 %v1549_v44  ;;  %v1734_v50 = vadd.s32 4294967295, %v1679_v25 }
  0x10   :  { %vm160_vm11 = vcmp.lt.s32.totalorder %v1679_v25, 1 }
  0x11   :  { %v1682_v28 = vand.u32 127, %v47_v27  ;;  %vm76_vm9 = vcmp.lt.s32.totalorder %v1685_v31, 128  ;;  %vm114_vm12 = vcmp.ge.s32.totalorder %v1734_v50, 0  ;;  %v1449_v50 = vld [vmem:[%s2568_s3 + $0x58] sm:$0xff] }
  0x12   :  { %191 = vrot.lane.b32.xlu0 %v1629_v14, %s1547_s0 }
  0x13   :  { %189 = vrot.lane.b32.xlu1 %v1632_v15, %s1547_s0  ;;  %v1688_v32 = vadd.s32 1, %v1682_v28  ;;  %v1737_v51 = vadd.s32 4294967295, %v1682_v28 }
  0x14   :  { %187 = vrot.lane.b32.xlu2 %v1647_v21, %s1547_s0 }
  0x15   :  { %vm77_vm10 = vcmp.lt.s32.totalorder %v1688_v32, 128  ;;  %vm115_vm13 = vcmp.ge.s32.totalorder %v1737_v51, 0 }
  0x1a   :  { %177 = vrot.lane.b32.xlu0 %v1657_v23, %s1547_s0 }
  0x1b   :  { %185 = vrot.lane.b32.xlu1 %v1654_v22, %s1547_s0 }
  0x1c   :  { %150 = vrot.lane.b32.xlu2 %v1604_v6, %s1548_s25 }
  0x22   :  { %158 = vrot.lane.b32.xlu0 %v1629_v14, %s1548_s25 }
  0x23   :  { %148 = vrot.lane.b32.xlu1 %v1607_v7, %s1548_s25 }
  0x24   :  { %156 = vrot.lane.b32.xlu2 %v1632_v15, %s1548_s25 }
  0x2a   :  { %146 = vrot.lane.b32.xlu0 %v1624_v13, %s1548_s25 }
  0x2b   :  { %154 = vrot.lane.b32.xlu1 %v1647_v21, %s1548_s25 }
  0x2c   :  { %144 = vrot.lane.b32.xlu2 %v1657_v23, %s1548_s25 }
  0x32   :  { %152 = vrot.lane.b32.xlu0 %v1654_v22, %s1548_s25 }
  0x33   :  { %235 = vperm.xlu1 %1489, %v217_v40  }
  0x34   :  { %230 = vperm.xlu2 %1490, %v216_v3  }
  0x3a   :  { %225 = vperm.xlu0 %1491, %v215_v59   ;;  %v402_v59 = vld [vmem:[%s2569_s4 + $0x8] sm:$0xff] }
  0x3b   :  { %220 = vperm.xlu1 %1489, %v214_v49  }
  0x66   :  { %v180_v26 = vpop.permute.xlu2 %179 }
  0x6e   :  { %v188_v33 = vpop.permute.xlu2 %187 }
  0x6f   :  { %v195_v41 = vsel %vm193_vm8, %v180_v26, %v188_v33  ;;  %v199_v42 = vsel %vm193_vm8, %v188_v33, %v180_v26 }
  0x76   :  { %v151_v43 = vpop.permute.xlu2 %150 }
  0x7c   :  { %v184_v29 = vpop.permute.xlu0 %183 }
  0x7d   :  { %v182_v30 = vpop.permute.xlu1 %181 }
  0x7e   :  { %v157_v52 = vpop.permute.xlu2 %156 }
  0x84   :  { %v192_v34 = vpop.permute.xlu0 %191 }
  0x85   :  { %v190_v35 = vpop.permute.xlu1 %189  ;;  %v197_v36 = vsel %vm193_vm8, %v184_v29, %v192_v34  ;;  %v201_v37 = vsel %vm193_vm8, %v192_v34, %v184_v29 }
  0x86   :  { %1302 = vmatpush.msk.msra.mxu0 %vm76_vm9, %v197_v36  ;;  %1314 = vmatpush.msk.msra.mxu1 %vm77_vm10, %v201_v37  ;;  %v196_v38 = vsel %vm193_vm8, %v182_v30, %v190_v35  ;;  %v200_v39 = vsel %vm193_vm8, %v190_v35, %v182_v30  ;;  %v145_v4 = vpop.permute.xlu2 %144 }
  0x88   :  { %1303 = vmatpush.msk.msra.mxu0 %vm76_vm9, %v196_v38  ;;  %1315 = vmatpush.msk.msra.mxu1 %vm77_vm10, %v200_v39 }
  0x8a   :  { %1304 = vmatpush.msk.msra.mxu0 %vm76_vm9, %v195_v41  ;;  %1316 = vmatpush.msk.msra.mxu1 %vm77_vm10, %v199_v42 }
  0x8c   :  { %v178_v46 = vpop.permute.xlu0 %177 }
  0x8d   :  { %v186_v45 = vpop.permute.xlu1 %185 }
  0x8e   :  { %v194_v47 = vsel %vm193_vm8, %v178_v46, %v186_v45  ;;  %v198_v48 = vsel %vm193_vm8, %v186_v45, %v178_v46  ;;  %v231_v37 = vpop.permute.xlu2 %230 }
  0x8f   :  { %1305 = vmatpush.msk.msra.mxu0 %vm76_vm9, %v194_v47  ;;  %1317 = vmatpush.msk.msra.mxu1 %vm77_vm10, %v198_v48 }
  0x91   :  { %259 = vmatpush.msra.mxu0 %v1604_v6  ;;  %288 = vmatpush.msra.mxu1 %v1629_v14  ;;  %v213_v14 = vld [vmem:[%s2566_s1 + $0x18] sm:$0xff] }
  0x93   :  { %260 = vmatpush.msra.mxu0 %v1607_v7  ;;  %289 = vmatpush.msra.mxu1 %v1632_v15  ;;  %v210_v7 = vld [vmem:[%s2566_s1] sm:$0xff] }
  0x94   :  { %v159_v54 = vpop.permute.xlu0 %158 }
  0x95   :  { %v149_v53 = vpop.permute.xlu1 %148  ;;  %261 = vmatpush.msra.mxu0 %v1624_v13  ;;  %290 = vmatpush.msra.mxu1 %v1647_v21  ;;  %v168_v55 = vsel %vm160_vm11, %v159_v54, %v151_v43  ;;  %v164_v56 = vsel %vm160_vm11, %v151_v43, %v159_v54  ;;  %v212_v13 = vld [vmem:[%s2566_s1 + $0x10] sm:$0xff] }
  0x96   :  { %v167_v57 = vsel %vm160_vm11, %v157_v52, %v149_v53  ;;  %v163_v58 = vsel %vm160_vm11, %v149_v53, %v157_v52 }
  0x97   :  { %262 = vmatpush.msra.mxu0 %v1657_v23  ;;  %291 = vmatpush.msra.mxu1 %v1654_v22 }
  0x99   :  { %1306 = vmatpush.msk.msra.mxu0 %vm114_vm12, %v168_v55  ;;  %1318 = vmatpush.msk.msra.mxu1 %vm115_vm13, %v164_v56 }
  0x9b   :  { %1307 = vmatpush.msk.msra.mxu0 %vm114_vm12, %v167_v57  ;;  %1319 = vmatpush.msk.msra.mxu1 %vm115_vm13, %v163_v58 }
  0x9c   :  { %v147_v61 = vpop.permute.xlu0 %146 }
  0x9d   :  { %v155_v60 = vpop.permute.xlu1 %154 }
  0x9e   :  { %v166_v62 = vsel %vm160_vm11, %v155_v60, %v147_v61  ;;  %v162_v63 = vsel %vm160_vm11, %v147_v61, %v155_v60  ;;  %v403_v60 = vld [vmem:[%s2569_s4 + $0x10] sm:$0xff]  ;;  %v404_v61 = vld [vmem:[%s2569_s4 + $0x18] sm:$0xff] }
  0x9f   :  { %1308 = vmatpush.msk.msra.mxu0 %vm114_vm12, %v166_v62  ;;  %1320 = vmatpush.msk.msra.mxu1 %vm115_vm13, %v162_v63  ;;  %v401_v62 = vld [vmem:[%s2569_s4] sm:$0xff] }
  0xa4   :  { %v153_v6 = vpop.permute.xlu0 %152 }
  0xa5   :  { %v165_v9 = vsel %vm160_vm11, %v153_v6, %v145_v4  ;;  %v161_v10 = vsel %vm160_vm11, %v145_v4, %v153_v6  ;;  %v236_v15 = vpop.permute.xlu1 %235 }
  0xa6   :  { %1309 = vmatpush.msk.msra.mxu0 %vm114_vm12, %v165_v9  ;;  %1321 = vmatpush.msk.msra.mxu1 %vm115_vm13, %v161_v10 }
  0xa7   :  { %1310 = vmatmul.msk.f32.vlgmr.msra.gmra.mxu0 %vm238_vm14, %v210_v7  ;;  %1322 = vmatmul.msk.f32.vlgmr.msra.gmra.mxu1 %vm238_vm14, %v210_v7 }
  0xac   :  { %v226_v24 = vpop.permute.xlu0 %225 }
  0xad   :  { %v221_v16 = vpop.permute.xlu1 %220 }
  0xaf   :  { %1311 = vmatmul.msk.f32.gmra.mxu0 %vm238_vm14, %v211_v11  ;;  %1323 = vmatmul.msk.f32.gmra.mxu1 %vm238_vm14, %v211_v11 }
  0xb7   :  { %1312 = vmatmul.msk.f32.gmra.mxu0 %vm238_vm14, %v212_v13  ;;  %1324 = vmatmul.msk.f32.gmra.mxu1 %vm238_vm14, %v212_v13 }
  0xbf   :  { %1313 = vmatmul.msk.f32.gmra.mxu0 %vm238_vm14, %v213_v14  ;;  %1325 = vmatmul.msk.f32.gmra.mxu1 %vm238_vm14, %v213_v14 }
 0x124   :  { %v268_v19 = vpop.f32.mrf.mxu0  ;;  %v297_v20 = vpop.f32.mrf.mxu1 }
 0x125   :  { %v269_v21 = vadd.f32 %v268_v19, %v221_v16  ;;  %v298_v56 = vadd.f32 %v297_v20, %v221_v16 }
 0x127   :  { %v317_v22 = vmul.f32 0.1, %v269_v21  ;;  %vm309_vm15 = vcmp.gt.f32.partialorder %v269_v21, 0.0  ;;  %v318_v57 = vmul.f32 0.1, %v298_v56  ;;  %vm310_vm6 = vcmp.gt.f32.partialorder %v298_v56, 0.0 }
 0x129   :  { %v1806_v23 = vsel %vm309_vm15, %v269_v21, %v317_v22  ;;  %v326_v58 = vsel %vm310_vm6, %v298_v56, %v318_v57 }
 0x12a   :  { %365 = vrot.lane.b32.xlu0 %v1806_v23, %s1547_s0 }
 0x12c   :  { %v271_v26 = vpop.f32.mrf.mxu0  ;;  %v300_v27 = vpop.f32.mrf.mxu1 }
 0x12d   :  { %v272_v29 = vadd.f32 %v271_v26, %v226_v24  ;;  %v301_v30 = vadd.f32 %v300_v27, %v226_v24 }
 0x12f   :  { %vm312_vm0 = vcmp.gt.f32.partialorder %v301_v30, 0.0  ;;  %v320_v33 = vmul.f32 0.1, %v301_v30  ;;  %vm311_vm1 = vcmp.gt.f32.partialorder %v272_v29, 0.0  ;;  %v319_v34 = vmul.f32 0.1, %v272_v29 }
 0x131   :  { %v1810_v35 = vsel %vm312_vm0, %v301_v30, %v320_v33  ;;  %v1812_v36 = vsel %vm311_vm1, %v272_v29, %v319_v34 }
 0x132   :  { %375 = vrot.lane.b32.xlu2 %v1810_v35, %s1547_s0  ;;  %367 = vrot.lane.b32.xlu1 %v1812_v36, %s1547_s0 }
 0x134   :  { %v274_v38 = vpop.f32.mrf.mxu0  ;;  %v303_v39 = vpop.f32.mrf.mxu1 }
 0x135   :  { %v275_v40 = vadd.f32 %v274_v38, %v231_v37  ;;  %v304_v41 = vadd.f32 %v303_v39, %v231_v37 }
 0x137   :  { %v321_v42 = vmul.f32 0.1, %v275_v40  ;;  %v322_v43 = vmul.f32 0.1, %v304_v41  ;;  %vm314_vm2 = vcmp.gt.f32.partialorder %v304_v41, 0.0  ;;  %vm313_vm3 = vcmp.gt.f32.partialorder %v275_v40, 0.0 }
 0x139   :  { %v1818_v44 = vsel %vm314_vm2, %v304_v41, %v322_v43  ;;  %v1820_v45 = vsel %vm313_vm3, %v275_v40, %v321_v42  ;;  %v397_v41 = vld [vmem:[%s2568_s3] sm:$0xff] }
 0x13a   :  { %377 = vrot.lane.b32.xlu0 %v1818_v44, %s1547_s0  ;;  %369 = vrot.lane.b32.xlu2 %v1820_v45, %s1547_s0 }
 0x13c   :  { %v277_v46 = vpop.f32.mrf.mxu0  ;;  %v306_v47 = vpop.f32.mrf.mxu1 }
 0x13d   :  { %v278_v48 = vadd.f32 %v277_v46, %v236_v15  ;;  %v307_v49 = vadd.f32 %v306_v47, %v236_v15  ;;  %v400_v46 = vld [vmem:[%s2568_s3 + $0x18] sm:$0xff] }
 0x13f   :  { %v323_v52 = vmul.f32 0.1, %v278_v48  ;;  %v324_v53 = vmul.f32 0.1, %v307_v49  ;;  %vm315_vm4 = vcmp.gt.f32.partialorder %v278_v48, 0.0  ;;  %vm316_vm5 = vcmp.gt.f32.partialorder %v307_v49, 0.0 }
 0x141   :  { %v331_v54 = vsel %vm315_vm4, %v278_v48, %v323_v52  ;;  %v332_v55 = vsel %vm316_vm5, %v307_v49, %v324_v53 }
 0x142   :  { %371 = vrot.lane.b32.xlu2 %v331_v54, %s1547_s0  ;;  %335 = vrot.lane.b32.xlu0 %v1812_v36, %s1548_s25 }
 0x143   :  { %379 = vrot.lane.b32.xlu1 %v332_v55, %s1547_s0 }
 0x14a   :  { %345 = vrot.lane.b32.xlu2 %v1818_v44, %s1548_s25  ;;  %347 = vrot.lane.b32.xlu0 %v332_v55, %s1548_s25 }
 0x14b   :  { %373 = vrot.lane.b32.xlu1 %v326_v58, %s1547_s0 }
 0x152   :  { %339 = vrot.lane.b32.xlu2 %v331_v54, %s1548_s25  ;;  %341 = vrot.lane.b32.xlu0 %v326_v58, %s1548_s25 }
 0x153   :  { %337 = vrot.lane.b32.xlu1 %v1820_v45, %s1548_s25 }
 0x15a   :  { %333 = vrot.lane.b32.xlu2 %v1806_v23, %s1548_s25  ;;  %412 = vperm.xlu0 %1491, %v402_v59  }
 0x15b   :  { %343 = vrot.lane.b32.xlu1 %v1810_v35, %s1548_s25 }
 0x162   :  { %417 = vperm.xlu2 %1490, %v403_v60  }
 0x163   :  { %422 = vperm.xlu1 %1489, %v404_v61  }
 0x16b   :  { %407 = vperm.xlu1 %1489, %v401_v62  }
 0x18c   :  { %v376_v63 = vpop.permute.xlu2 %375 }
 0x194   :  { %v370_v3 = vpop.permute.xlu2 %369 }
 0x19c   :  { %v366_v4 = vpop.permute.xlu0 %365  ;;  %v372_v9 = vpop.permute.xlu2 %371 }
 0x1a4   :  { %v368_v6 = vpop.permute.xlu1 %367  ;;  %v346_v21 = vpop.permute.xlu2 %345 }
 0x1a5   :  { %v382_v19 = vsel %vm193_vm8, %v368_v6, %v376_v63  ;;  %v386_v20 = vsel %vm193_vm8, %v376_v63, %v368_v6 }
 0x1ac   :  { %v378_v7 = vpop.permute.xlu0 %377  ;;  %v340_v29 = vpop.permute.xlu2 %339 }
 0x1ad   :  { %v383_v14 = vsel %vm193_vm8, %v370_v3, %v378_v7  ;;  %v387_v15 = vsel %vm193_vm8, %v378_v7, %v370_v3 }
 0x1b4   :  { %v336_v16 = vpop.permute.xlu0 %335  ;;  %v334_v40 = vpop.permute.xlu2 %333 }
 0x1b5   :  { %v380_v10 = vpop.permute.xlu1 %379 }
 0x1b6   :  { %v384_v11 = vsel %vm193_vm8, %v372_v9, %v380_v10  ;;  %v388_v13 = vsel %vm193_vm8, %v380_v10, %v372_v9 }
 0x1b7   :  { %1326 = vmatpush.msk.msra.mxu2 %vm76_vm9, %v384_v11  ;;  %1338 = vmatpush.msk.msra.mxu3 %vm77_vm10, %v388_v13 }
 0x1b9   :  { %1327 = vmatpush.msk.msra.mxu2 %vm76_vm9, %v383_v14  ;;  %1339 = vmatpush.msk.msra.mxu3 %vm77_vm10, %v387_v15 }
 0x1bb   :  { %1328 = vmatpush.msk.msra.mxu2 %vm76_vm9, %v382_v19  ;;  %1340 = vmatpush.msk.msra.mxu3 %vm77_vm10, %v386_v20 }
 0x1bc   :  { %v348_v27 = vpop.permute.xlu0 %347 }
 0x1bd   :  { %v374_v22 = vpop.permute.xlu1 %373  ;;  %v356_v33 = vsel %vm160_vm11, %v348_v27, %v340_v29  ;;  %v352_v34 = vsel %vm160_vm11, %v340_v29, %v348_v27 }
 0x1be   :  { %v381_v24 = vsel %vm193_vm8, %v366_v4, %v374_v22  ;;  %v385_v26 = vsel %vm193_vm8, %v374_v22, %v366_v4  ;;  %v418_v4 = vpop.permute.xlu2 %417 }
 0x1bf   :  { %1329 = vmatpush.msk.msra.mxu2 %vm76_vm9, %v381_v24  ;;  %1341 = vmatpush.msk.msra.mxu3 %vm77_vm10, %v385_v26 }
 0x1c1   :  { %445 = vmatpush.msra.mxu2 %v331_v54  ;;  %474 = vmatpush.msra.mxu3 %v332_v55 }
 0x1c3   :  { %446 = vmatpush.msra.mxu2 %v1820_v45  ;;  %475 = vmatpush.msra.mxu3 %v1818_v44  ;;  %v398_v44 = vld [vmem:[%s2568_s3 + $0x8] sm:$0xff]  ;;  %v399_v45 = vld [vmem:[%s2568_s3 + $0x10] sm:$0xff] }
 0x1c5   :  { %v338_v30 = vpop.permute.xlu1 %337  ;;  %447 = vmatpush.msra.mxu2 %v1812_v36  ;;  %476 = vmatpush.msra.mxu3 %v1810_v35 }
 0x1c6   :  { %v355_v36 = vsel %vm160_vm11, %v346_v21, %v338_v30  ;;  %v351_v35 = vsel %vm160_vm11, %v338_v30, %v346_v21 }
 0x1c7   :  { %448 = vmatpush.msra.mxu2 %v1806_v23  ;;  %477 = vmatpush.msra.mxu3 %v326_v58  ;;  %v342_v23 = vpop.permute.xlu0 %341 }
 0x1c8   :  { %v353_v42 = vsel %vm160_vm11, %v342_v23, %v334_v40  ;;  %v349_v43 = vsel %vm160_vm11, %v334_v40, %v342_v23  ;;  %v1354_v23 = vld [vmem:[%s2567_s2 + $0x20] sm:$0xff] }
 0x1c9   :  { %1330 = vmatpush.msk.msra.mxu2 %vm114_vm12, %v356_v33  ;;  %1342 = vmatpush.msk.msra.mxu3 %vm115_vm13, %v352_v34 }
 0x1cb   :  { %1331 = vmatpush.msk.msra.mxu2 %vm114_vm12, %v355_v36  ;;  %1343 = vmatpush.msk.msra.mxu3 %vm115_vm13, %v351_v35  ;;  %v1355_v36 = vld [vmem:[%s2567_s2 + $0x28] sm:$0xff]  ;;  %v1357_v35 = vld [vmem:[%s2567_s2 + $0x38] sm:$0xff] }
 0x1cd   :  { %v344_v37 = vpop.permute.xlu1 %343 }
 0x1ce   :  { %v354_v38 = vsel %vm160_vm11, %v344_v37, %v336_v16  ;;  %v350_v39 = vsel %vm160_vm11, %v336_v16, %v344_v37 }
 0x1cf   :  { %1332 = vmatpush.msk.msra.mxu2 %vm114_vm12, %v354_v38  ;;  %1344 = vmatpush.msk.msra.mxu3 %vm115_vm13, %v350_v39  ;;  %v413_v56 = vpop.permute.xlu0 %412 }
 0x1d1   :  { %1333 = vmatpush.msk.msra.mxu2 %vm114_vm12, %v353_v42  ;;  %1345 = vmatpush.msk.msra.mxu3 %vm115_vm13, %v349_v43  ;;  %v80_v42 = vadd.s32 3, %v1679_v25  ;;  %v81_v43 = vadd.s32 3, %v1682_v28 }
 0x1d2   :  { %1334 = vmatmul.msk.f32.vlgmr.msra.gmra.mxu2 %vm238_vm14, %v397_v41  ;;  %1346 = vmatmul.msk.f32.vlgmr.msra.gmra.mxu3 %vm238_vm14, %v397_v41 }
 0x1d3   :  { %vm84_vm6 = vcmp.lt.s32.totalorder %v80_v42, 128 }
 0x1d5   :  { %v423_v47 = vpop.permute.xlu1 %422 }
 0x1da   :  { %1335 = vmatmul.msk.f32.gmra.mxu2 %vm238_vm14, %v398_v44  ;;  %1347 = vmatmul.msk.f32.gmra.mxu3 %vm238_vm14, %v398_v44 }
 0x1dd   :  { %v408_v48 = vpop.permute.xlu1 %407 }
 0x1e2   :  { %1336 = vmatmul.msk.f32.gmra.mxu2 %vm238_vm14, %v399_v45  ;;  %1348 = vmatmul.msk.f32.gmra.mxu3 %vm238_vm14, %v399_v45 }
 0x1ea   :  { %1337 = vmatmul.msk.f32.gmra.mxu2 %vm238_vm14, %v400_v46  ;;  %1349 = vmatmul.msk.f32.gmra.mxu3 %vm238_vm14, %v400_v46 }
 0x255   :  { %v454_v49 = vpop.f32.mrf.mxu2  ;;  %v483_v52 = vpop.f32.mrf.mxu3 }
 0x256   :  { %v455_v53 = vadd.f32 %v454_v49, %v408_v48  ;;  %v484_v26 = vadd.f32 %v483_v52, %v408_v48 }
 0x258   :  { %v1944_v54 = vadd.f32 %v455_v53, %v1637_v18  ;;  %v2006_v34 = vadd.f32 %v484_v26, %v1635_v17  ;;  %v1356_v17 = vld [vmem:[%s2567_s2 + $0x30] sm:$0xff]  ;;  %v1353_v26 = vld [vmem:[%s2566_s1 + $0x38] sm:$0xff] }
 0x25a   :  { %vm503_vm7 = vcmp.gt.f32.partialorder %v1944_v54, 0.0  ;;  %v511_v55 = vmul.f32 0.1, %v1944_v54  ;;  %vm504_vm5 = vcmp.gt.f32.partialorder %v2006_v34, 0.0 }
 0x25c   :  { %v1949_v57 = vsel %vm503_vm7, %v1944_v54, %v511_v55  ;;  %vm85_vm7 = vcmp.lt.s32.totalorder %v81_v43, 128 }
 0x25d   :  { %v457_v58 = vpop.f32.mrf.mxu2  ;;  %560 = vrot.lane.b32.xlu2 %v1949_v57, %s1550_s11  ;;  %v486_v59 = vpop.f32.mrf.mxu3 }
 0x25e   :  { %v458_v60 = vadd.f32 %v457_v58, %v413_v56  ;;  %v487_v61 = vadd.f32 %v486_v59, %v413_v56 }
 0x260   :  { %v1954_v62 = vadd.f32 %v458_v60, %v1609_v8  ;;  %v1957_v18 = vadd.f32 %v487_v61, %v1621_v12  ;;  %v104_v61 = vadd.s32 4294967293, %v1679_v25 }
 0x262   :  { %vm506_vm15 = vcmp.gt.f32.partialorder %v1957_v18, 0.0  ;;  %v514_v63 = vmul.f32 0.1, %v1957_v18  ;;  %vm505_vm0 = vcmp.gt.f32.partialorder %v1954_v62, 0.0  ;;  %v513_v3 = vmul.f32 0.1, %v1954_v62 }
 0x264   :  { %v1964_v6 = vsel %vm506_vm15, %v1957_v18, %v514_v63  ;;  %v1967_v7 = vsel %vm505_vm0, %v1954_v62, %v513_v3  ;;  %vm576_vm15 = vcmp.lt.s32.totalorder %v1679_v25, 125  ;;  %v105_v63 = vadd.s32 4294967293, %v1682_v28 }
 0x265   :  { %v460_v8 = vpop.f32.mrf.mxu2  ;;  %v489_v9 = vpop.f32.mrf.mxu3  ;;  %570 = vrot.lane.b32.xlu1 %v1964_v6, %s1550_s11  ;;  %562 = vrot.lane.b32.xlu0 %v1967_v7, %s1550_s11  ;;  %vm543_vm0 = vcmp.lt.s32.totalorder %v1679_v25, 3 }
 0x266   :  { %v461_v12 = vadd.f32 %v460_v8, %v418_v4  ;;  %v490_v10 = vadd.f32 %v489_v9, %v418_v4 }
 0x268   :  { %v1974_v11 = vadd.f32 %v461_v12, %v1593_v1  ;;  %v1977_v13 = vadd.f32 %v490_v10, %v1601_v5 }
 0x26a   :  { %vm508_vm1 = vcmp.gt.f32.partialorder %v1977_v13, 0.0  ;;  %v516_v14 = vmul.f32 0.1, %v1977_v13  ;;  %vm507_vm2 = vcmp.gt.f32.partialorder %v1974_v11, 0.0  ;;  %v515_v15 = vmul.f32 0.1, %v1974_v11 }
 0x26c   :  { %v1984_v16 = vsel %vm508_vm1, %v1977_v13, %v516_v14  ;;  %v1987_v19 = vsel %vm507_vm2, %v1974_v11, %v515_v15  ;;  %vm106_vm1 = vcmp.ge.s32.totalorder %v104_v61, 0  ;;  %vm107_vm2 = vcmp.ge.s32.totalorder %v105_v63, 0 }
 0x26d   :  { %v463_v20 = vpop.f32.mrf.mxu2  ;;  %v492_v1 = vpop.f32.mrf.mxu3  ;;  %572 = vrot.lane.b32.xlu2 %v1984_v16, %s1550_s11  ;;  %564 = vrot.lane.b32.xlu1 %v1987_v19, %s1550_s11 }
 0x26e   :  { %v464_v5 = vadd.f32 %v463_v20, %v423_v47  ;;  %v493_v21 = vadd.f32 %v492_v1, %v423_v47 }
 0x270   :  { %v1994_v22 = vadd.f32 %v464_v5, %v1591_v0  ;;  %v1997_v24 = vadd.f32 %v493_v21, %v1595_v2  ;;  %v512_v0 = vmul.f32 0.1, %v2006_v34  ;;  %v1351_v5 = vld [vmem:[%s2566_s1 + $0x28] sm:$0xff]  ;;  %v1352_v21 = vld [vmem:[%s2566_s1 + $0x30] sm:$0xff] }
 0x272   :  { %vm509_vm3 = vcmp.gt.f32.partialorder %v1994_v22, 0.0  ;;  %v517_v27 = vmul.f32 0.1, %v1994_v22  ;;  %vm510_vm4 = vcmp.gt.f32.partialorder %v1997_v24, 0.0  ;;  %v518_v29 = vmul.f32 0.1, %v1997_v24 }
 0x273   :  { %v520_v2 = vsel %vm504_vm5, %v2006_v34, %v512_v0 }
 0x274   :  { %v525_v30 = vsel %vm509_vm3, %v1994_v22, %v517_v27  ;;  %v526_v33 = vsel %vm510_vm4, %v1997_v24, %v518_v29 }
 0x275   :  { %566 = vrot.lane.b32.xlu2 %v525_v30, %s1550_s11  ;;  %539 = vrot.lane.b32.xlu1 %v1984_v16, %s1551_s12 }
 0x276   :  { %574 = vrot.lane.b32.xlu0 %v526_v33, %s1550_s11 }
 0x27d   :  { %533 = vrot.lane.b32.xlu1 %v525_v30, %s1551_s12  ;;  %529 = vrot.lane.b32.xlu2 %v1967_v7, %s1551_s12 }
 0x27e   :  { %568 = vrot.lane.b32.xlu0 %v520_v2, %s1550_s11 }
 0x285   :  { %527 = vrot.lane.b32.xlu1 %v1949_v57, %s1551_s12  ;;  %541 = vrot.lane.b32.xlu2 %v526_v33, %s1551_s12 }
 0x286   :  { %531 = vrot.lane.b32.xlu0 %v1987_v19, %s1551_s12 }
 0x28d   :  { %615 = vperm.xlu1 %1489, %v1356_v17   ;;  %535 = vrot.lane.b32.xlu2 %v520_v2, %s1551_s12 }
 0x28e   :  { %537 = vrot.lane.b32.xlu0 %v1964_v6, %s1551_s12 }
 0x295   :  { %610 = vperm.xlu2 %1490, %v1355_v36  }
 0x296   :  { %620 = vperm.xlu0 %1491, %v1357_v35  }
 0x29e   :  { %605 = vperm.xlu0 %1491, %v1354_v23  }
 0x2b7   :  { %v561_v37 = vpop.permute.xlu2 %560 }
 0x2c7   :  { %v573_v39 = vpop.permute.xlu2 %572 }
 0x2cf   :  { %v567_v44 = vpop.permute.xlu2 %566 }
 0x2d7   :  { %v571_v38 = vpop.permute.xlu1 %570  ;;  %v563_v40 = vpop.permute.xlu0 %562 }
 0x2d8   :  { %v578_v53 = vsel %vm576_vm15, %v563_v40, %v571_v38  ;;  %v582_v55 = vsel %vm576_vm15, %v571_v38, %v563_v40  ;;  %v530_v56 = vpop.permute.xlu2 %529 }
 0x2df   :  { %v565_v41 = vpop.permute.xlu1 %564 }
 0x2e0   :  { %v579_v48 = vsel %vm576_vm15, %v565_v41, %v573_v39  ;;  %v583_v49 = vsel %vm576_vm15, %v573_v39, %v565_v41  ;;  %v542_v4 = vpop.permute.xlu2 %541 }
 0x2e7   :  { %v540_v52 = vpop.permute.xlu1 %539 }
 0x2e8   :  { %v575_v45 = vpop.permute.xlu0 %574 }
 0x2e9   :  { %v580_v46 = vsel %vm576_vm15, %v567_v44, %v575_v45  ;;  %v584_v47 = vsel %vm576_vm15, %v575_v45, %v567_v44 }
 0x2ea   :  { %1358 = vmatpush.msk.msrb.mxu0 %vm84_vm6, %v580_v46  ;;  %1370 = vmatpush.msk.msrb.mxu1 %vm85_vm7, %v584_v47 }
 0x2ec   :  { %1359 = vmatpush.msk.msrb.mxu0 %vm84_vm6, %v579_v48  ;;  %1371 = vmatpush.msk.msrb.mxu1 %vm85_vm7, %v583_v49 }
 0x2ee   :  { %1360 = vmatpush.msk.msrb.mxu0 %vm84_vm6, %v578_v53  ;;  %1372 = vmatpush.msk.msrb.mxu1 %vm85_vm7, %v582_v55 }
 0x2ef   :  { %v534_v3 = vpop.permute.xlu1 %533 }
 0x2f0   :  { %v569_v58 = vpop.permute.xlu0 %568  ;;  %v551_v9 = vsel %vm543_vm0, %v542_v4, %v534_v3  ;;  %v547_v12 = vsel %vm543_vm0, %v534_v3, %v542_v4 }
 0x2f1   :  { %v577_v59 = vsel %vm576_vm15, %v561_v37, %v569_v58  ;;  %v581_v60 = vsel %vm576_vm15, %v569_v58, %v561_v37 }
 0x2f2   :  { %1361 = vmatpush.msk.msrb.mxu0 %vm84_vm6, %v577_v59  ;;  %1373 = vmatpush.msk.msrb.mxu1 %vm85_vm7, %v581_v60 }
 0x2f4   :  { %643 = vmatpush.msrb.mxu0 %v525_v30  ;;  %672 = vmatpush.msrb.mxu1 %v526_v33 }
 0x2f6   :  { %644 = vmatpush.msrb.mxu0 %v1987_v19  ;;  %673 = vmatpush.msrb.mxu1 %v1984_v16  ;;  %v536_v16 = vpop.permute.xlu2 %535  ;;  %v1350_v19 = vld [vmem:[%s2566_s1 + $0x20] sm:$0xff] }
 0x2f8   :  { %645 = vmatpush.msrb.mxu0 %v1967_v7  ;;  %674 = vmatpush.msrb.mxu1 %v1964_v6  ;;  %v532_v8 = vpop.permute.xlu0 %531 }
 0x2f9   :  { %v550_v6 = vsel %vm543_vm0, %v540_v52, %v532_v8  ;;  %v546_v7 = vsel %vm543_vm0, %v532_v8, %v540_v52 }
 0x2fa   :  { %646 = vmatpush.msrb.mxu0 %v1949_v57  ;;  %675 = vmatpush.msrb.mxu1 %v520_v2  ;;  %v528_v57 = vpop.permute.xlu1 %527 }
 0x2fb   :  { %v548_v20 = vsel %vm543_vm0, %v536_v16, %v528_v57  ;;  %v544_v1 = vsel %vm543_vm0, %v528_v57, %v536_v16  ;;  %v1386_v57 = vld [vmem:[%s2569_s4 + $0x20] sm:$0xff] }
 0x2fc   :  { %1362 = vmatpush.msk.msrb.mxu0 %vm106_vm1, %v551_v9  ;;  %1374 = vmatpush.msk.msrb.mxu1 %vm107_vm2, %v547_v12  ;;  %v1388_v12 = vld [vmem:[%s2569_s4 + $0x30] sm:$0xff] }
 0x2fe   :  { %1363 = vmatpush.msk.msrb.mxu0 %vm106_vm1, %v550_v6  ;;  %1375 = vmatpush.msk.msrb.mxu1 %vm107_vm2, %v546_v7  ;;  %v611_v36 = vpop.permute.xlu2 %610  ;;  %v1389_v6 = vld [vmem:[%s2569_s4 + $0x38] sm:$0xff]  ;;  %v1387_v7 = vld [vmem:[%s2569_s4 + $0x28] sm:$0xff] }
 0x300   :  { %v538_v10 = vpop.permute.xlu0 %537 }
 0x301   :  { %v549_v14 = vsel %vm543_vm0, %v538_v10, %v530_v56  ;;  %v545_v15 = vsel %vm543_vm0, %v530_v56, %v538_v10 }
 0x302   :  { %1364 = vmatpush.msk.msrb.mxu0 %vm106_vm1, %v549_v14  ;;  %1376 = vmatpush.msk.msrb.mxu1 %vm107_vm2, %v545_v15  ;;  %v616_v43 = vpop.permute.xlu1 %615 }
 0x304   :  { %1365 = vmatpush.msk.msrb.mxu0 %vm106_vm1, %v548_v20  ;;  %1377 = vmatpush.msk.msrb.mxu1 %vm107_vm2, %v544_v1 }
 0x305   :  { %1366 = vmatmul.msk.f32.vlgmr.msrb.gmra.mxu0 %vm238_vm14, %v1350_v19  ;;  %1378 = vmatmul.msk.f32.vlgmr.msrb.gmra.mxu1 %vm238_vm14, %v1350_v19 }
 0x308   :  { %v621_v27 = vpop.permute.xlu0 %620 }
 0x30d   :  { %1367 = vmatmul.msk.f32.gmra.mxu0 %vm238_vm14, %v1351_v5  ;;  %1379 = vmatmul.msk.f32.gmra.mxu1 %vm238_vm14, %v1351_v5 }
 0x310   :  { %v606_v29 = vpop.permute.xlu0 %605 }
 0x315   :  { %1368 = vmatmul.msk.f32.gmra.mxu0 %vm238_vm14, %v1352_v21  ;;  %1380 = vmatmul.msk.f32.gmra.mxu1 %vm238_vm14, %v1352_v21 }
 0x31d   :  { %1369 = vmatmul.msk.f32.gmra.mxu0 %vm238_vm14, %v1353_v26  ;;  %1381 = vmatmul.msk.f32.gmra.mxu1 %vm238_vm14, %v1353_v26 }
 0x382   :  { %v652_v30 = vpop.f32.mrf.mxu0  ;;  %v681_v33 = vpop.f32.mrf.mxu1 }
 0x383   :  { %v653_v0 = vadd.f32 %v652_v30, %v606_v29  ;;  %v682_v63 = vadd.f32 %v681_v33, %v606_v29 }
 0x385   :  { %v701_v2 = vmul.f32 0.1, %v653_v0  ;;  %vm693_vm3 = vcmp.gt.f32.partialorder %v653_v0, 0.0  ;;  %v702_v8 = vmul.f32 0.1, %v682_v63  ;;  %vm694_vm1 = vcmp.gt.f32.partialorder %v682_v63, 0.0 }
 0x387   :  { %v2110_v17 = vsel %vm693_vm3, %v653_v0, %v701_v2  ;;  %v710_v9 = vsel %vm694_vm1, %v682_v63, %v702_v8 }
 0x388   :  { %749 = vrot.lane.b32.xlu1 %v2110_v17, %s1547_s0 }
 0x38a   :  { %v655_v35 = vpop.f32.mrf.mxu0  ;;  %v684_v23 = vpop.f32.mrf.mxu1 }
 0x38b   :  { %v656_v37 = vadd.f32 %v655_v35, %v611_v36  ;;  %v685_v38 = vadd.f32 %v684_v23, %v611_v36 }
 0x38d   :  { %v703_v39 = vmul.f32 0.1, %v656_v37  ;;  %v704_v40 = vmul.f32 0.1, %v685_v38  ;;  %vm695_vm4 = vcmp.gt.f32.partialorder %v656_v37, 0.0  ;;  %vm696_vm5 = vcmp.gt.f32.partialorder %v685_v38, 0.0 }
 0x38f   :  { %v2114_v41 = vsel %vm695_vm4, %v656_v37, %v703_v39  ;;  %v2116_v42 = vsel %vm696_vm5, %v685_v38, %v704_v40 }
 0x390   :  { %751 = vrot.lane.b32.xlu2 %v2114_v41, %s1547_s0  ;;  %759 = vrot.lane.b32.xlu0 %v2116_v42, %s1547_s0 }
 0x392   :  { %v658_v44 = vpop.f32.mrf.mxu0  ;;  %v687_v45 = vpop.f32.mrf.mxu1 }
 0x393   :  { %v659_v46 = vadd.f32 %v658_v44, %v616_v43  ;;  %v688_v47 = vadd.f32 %v687_v45, %v616_v43 }
 0x395   :  { %v705_v48 = vmul.f32 0.1, %v659_v46  ;;  %v706_v49 = vmul.f32 0.1, %v688_v47  ;;  %vm697_vm6 = vcmp.gt.f32.partialorder %v659_v46, 0.0  ;;  %vm698_vm7 = vcmp.gt.f32.partialorder %v688_v47, 0.0 }
 0x397   :  { %v2122_v52 = vsel %vm697_vm6, %v659_v46, %v705_v48  ;;  %v2124_v53 = vsel %vm698_vm7, %v688_v47, %v706_v49  ;;  %v1382_v47 = vld [vmem:[%s2568_s3 + $0x20] sm:$0xff] }
 0x398   :  { %753 = vrot.lane.b32.xlu0 %v2122_v52, %s1547_s0  ;;  %761 = vrot.lane.b32.xlu1 %v2124_v53, %s1547_s0 }
 0x39a   :  { %v661_v55 = vpop.f32.mrf.mxu0  ;;  %v690_v56 = vpop.f32.mrf.mxu1 }
 0x39b   :  { %v662_v58 = vadd.f32 %v661_v55, %v621_v27  ;;  %v691_v59 = vadd.f32 %v690_v56, %v621_v27  ;;  %v1385_v55 = vld [vmem:[%s2568_s3 + $0x38] sm:$0xff] }
 0x39d   :  { %v707_v60 = vmul.f32 0.1, %v662_v58  ;;  %v708_v61 = vmul.f32 0.1, %v691_v59  ;;  %vm700_vm15 = vcmp.gt.f32.partialorder %v691_v59, 0.0  ;;  %vm699_vm0 = vcmp.gt.f32.partialorder %v662_v58, 0.0 }
 0x39f   :  { %v716_v3 = vsel %vm700_vm15, %v691_v59, %v708_v61  ;;  %v715_v4 = vsel %vm699_vm0, %v662_v58, %v707_v60 }
 0x3a0   :  { %729 = vrot.lane.b32.xlu0 %v2124_v53, %s1548_s25  ;;  %763 = vrot.lane.b32.xlu2 %v716_v3, %s1547_s0 }
 0x3a1   :  { %755 = vrot.lane.b32.xlu1 %v715_v4, %s1547_s0 }
 0x3a8   :  { %723 = vrot.lane.b32.xlu0 %v715_v4, %s1548_s25  ;;  %757 = vrot.lane.b32.xlu2 %v710_v9, %s1547_s0 }
 0x3a9   :  { %719 = vrot.lane.b32.xlu1 %v2114_v41, %s1548_s25 }
 0x3b0   :  { %721 = vrot.lane.b32.xlu2 %v2122_v52, %s1548_s25  ;;  %717 = vrot.lane.b32.xlu0 %v2110_v17, %s1548_s25 }
 0x3b1   :  { %731 = vrot.lane.b32.xlu1 %v716_v3, %s1548_s25 }
 0x3b8   :  { %727 = vrot.lane.b32.xlu2 %v2116_v42, %s1548_s25  ;;  %803 = vperm.xlu0 %1491, %v1388_v12  }
 0x3b9   :  { %725 = vrot.lane.b32.xlu1 %v710_v9, %s1548_s25 }
 0x3c0   :  { %808 = vperm.xlu2 %1490, %v1389_v6  }
 0x3c1   :  { %798 = vperm.xlu1 %1489, %v1387_v7  }
 0x3c8   :  { %793 = vperm.xlu2 %1490, %v1386_v57  }
 0x3ea   :  { %v752_v10 = vpop.permute.xlu2 %751 }
 0x3fa   :  { %v750_v14 = vpop.permute.xlu1 %749  ;;  %v764_v16 = vpop.permute.xlu2 %763 }
 0x402   :  { %v760_v15 = vpop.permute.xlu0 %759  ;;  %v758_v1 = vpop.permute.xlu2 %757 }
 0x403   :  { %v766_v33 = vsel %vm193_vm8, %v752_v10, %v760_v15  ;;  %v770_v0 = vsel %vm193_vm8, %v760_v15, %v752_v10  ;;  %v765_v2 = vsel %vm193_vm8, %v750_v14, %v758_v1  ;;  %v769_v36 = vsel %vm193_vm8, %v758_v1, %v750_v14 }
 0x40a   :  { %v762_v19 = vpop.permute.xlu1 %761  ;;  %v754_v20 = vpop.permute.xlu0 %753 }
 0x40b   :  { %v767_v27 = vsel %vm193_vm8, %v754_v20, %v762_v19  ;;  %v771_v29 = vsel %vm193_vm8, %v762_v19, %v754_v20  ;;  %v722_v23 = vpop.permute.xlu2 %721 }
 0x412   :  { %v730_v30 = vpop.permute.xlu0 %729 }
 0x413   :  { %v756_v5 = vpop.permute.xlu1 %755 }
 0x414   :  { %v768_v21 = vsel %vm193_vm8, %v756_v5, %v764_v16  ;;  %v772_v26 = vsel %vm193_vm8, %v764_v16, %v756_v5 }
 0x415   :  { %1390 = vmatpush.msk.msrb.mxu2 %vm76_vm9, %v768_v21  ;;  %1402 = vmatpush.msk.msrb.mxu3 %vm77_vm10, %v772_v26 }
 0x417   :  { %1391 = vmatpush.msk.msrb.mxu2 %vm76_vm9, %v767_v27  ;;  %1403 = vmatpush.msk.msrb.mxu3 %vm77_vm10, %v771_v29 }
 0x419   :  { %1392 = vmatpush.msk.msrb.mxu2 %vm76_vm9, %v766_v33  ;;  %1404 = vmatpush.msk.msrb.mxu3 %vm77_vm10, %v770_v0 }
 0x41a   :  { %v724_v37 = vpop.permute.xlu0 %723 }
 0x41b   :  { %v720_v35 = vpop.permute.xlu1 %719  ;;  %1393 = vmatpush.msk.msrb.mxu2 %vm76_vm9, %v765_v2  ;;  %1405 = vmatpush.msk.msrb.mxu3 %vm77_vm10, %v769_v36 }
 0x41d   :  { %831 = vmatpush.msrb.mxu2 %v715_v4  ;;  %860 = vmatpush.msrb.mxu3 %v716_v3 }
 0x41f   :  { %832 = vmatpush.msrb.mxu2 %v2122_v52  ;;  %861 = vmatpush.msrb.mxu3 %v2124_v53  ;;  %v1383_v52 = vld [vmem:[%s2568_s3 + $0x28] sm:$0xff]  ;;  %v1384_v53 = vld [vmem:[%s2568_s3 + $0x30] sm:$0xff] }
 0x421   :  { %833 = vmatpush.msrb.mxu2 %v2114_v41  ;;  %862 = vmatpush.msrb.mxu3 %v2116_v42  ;;  %v739_v41 = vsel %vm160_vm11, %v730_v30, %v722_v23  ;;  %v735_v42 = vsel %vm160_vm11, %v722_v23, %v730_v30 }
 0x422   :  { %v718_v45 = vpop.permute.xlu0 %717 }
 0x423   :  { %v732_v38 = vpop.permute.xlu1 %731  ;;  %834 = vmatpush.msrb.mxu2 %v2110_v17  ;;  %863 = vmatpush.msrb.mxu3 %v710_v9  ;;  %v728_v17 = vpop.permute.xlu2 %727 }
 0x424   :  { %v740_v39 = vsel %vm160_vm11, %v732_v38, %v724_v37  ;;  %v736_v40 = vsel %vm160_vm11, %v724_v37, %v732_v38  ;;  %v738_v43 = vsel %vm160_vm11, %v728_v17, %v720_v35  ;;  %v734_v44 = vsel %vm160_vm11, %v720_v35, %v728_v17  ;;  %v1418_v17 = vld [vmem:[%s2567_s2 + $0x40] sm:$0xff] }
 0x425   :  { %1394 = vmatpush.msk.msrb.mxu2 %vm114_vm12, %v740_v39  ;;  %1406 = vmatpush.msk.msrb.mxu3 %vm115_vm13, %v736_v40 }
 0x427   :  { %1395 = vmatpush.msk.msrb.mxu2 %vm114_vm12, %v739_v41  ;;  %1407 = vmatpush.msk.msrb.mxu3 %vm115_vm13, %v735_v42  ;;  %v1419_v41 = vld [vmem:[%s2567_s2 + $0x48] sm:$0xff]  ;;  %v1421_v42 = vld [vmem:[%s2567_s2 + $0x58] sm:$0xff] }
 0x429   :  { %1396 = vmatpush.msk.msrb.mxu2 %vm114_vm12, %v738_v43  ;;  %1408 = vmatpush.msk.msrb.mxu3 %vm115_vm13, %v734_v44 }
 0x42a   :  { %v804_v15 = vpop.permute.xlu0 %803 }
 0x42b   :  { %v726_v46 = vpop.permute.xlu1 %725  ;;  %v809_v56 = vpop.permute.xlu2 %808 }
 0x42c   :  { %v737_v48 = vsel %vm160_vm11, %v726_v46, %v718_v45  ;;  %v733_v49 = vsel %vm160_vm11, %v718_v45, %v726_v46 }
 0x42d   :  { %1397 = vmatpush.msk.msrb.mxu2 %vm114_vm12, %v737_v48  ;;  %1409 = vmatpush.msk.msrb.mxu3 %vm115_vm13, %v733_v49  ;;  %v88_v48 = vadd.s32 5, %v1679_v25  ;;  %v89_v49 = vadd.s32 5, %v1682_v28 }
 0x42e   :  { %1398 = vmatmul.msk.f32.vlgmr.msrb.gmra.mxu2 %vm238_vm14, %v1382_v47  ;;  %1410 = vmatmul.msk.f32.vlgmr.msrb.gmra.mxu3 %vm238_vm14, %v1382_v47 }
 0x42f   :  { %vm92_vm1 = vcmp.lt.s32.totalorder %v88_v48, 128 }
 0x433   :  { %v794_v58 = vpop.permute.xlu2 %793  ;;  %v799_v4 = vpop.permute.xlu1 %798 }
 0x436   :  { %1399 = vmatmul.msk.f32.gmra.mxu2 %vm238_vm14, %v1383_v52  ;;  %1411 = vmatmul.msk.f32.gmra.mxu3 %vm238_vm14, %v1383_v52 }
 0x43e   :  { %1400 = vmatmul.msk.f32.gmra.mxu2 %vm238_vm14, %v1384_v53  ;;  %1412 = vmatmul.msk.f32.gmra.mxu3 %vm238_vm14, %v1384_v53 }
 0x446   :  { %1401 = vmatmul.msk.f32.gmra.mxu2 %vm238_vm14, %v1385_v55  ;;  %1413 = vmatmul.msk.f32.gmra.mxu3 %vm238_vm14, %v1385_v55 }
 0x4b1   :  { %v840_v59 = vpop.f32.mrf.mxu2  ;;  %v869_v60 = vpop.f32.mrf.mxu3 }
 0x4b2   :  { %v841_v61 = vadd.f32 %v840_v59, %v794_v58  ;;  %v870_v2 = vadd.f32 %v869_v60, %v794_v58 }
 0x4b4   :  { %v2248_v63 = vadd.f32 %v841_v61, %v1944_v54  ;;  %v2308_v38 = vadd.f32 %v870_v2, %v2006_v34  ;;  %v1420_v34 = vld [vmem:[%s2567_s2 + $0x50] sm:$0xff]  ;;  %s1289_s2 = sshll.u32 %s2570_s5, 4  ;;  %s1290_s2 = int_to_ptr.hbm [resolvable:$true] %s1289_s2 }
 0x4b6   :  { %vm889_vm2 = vcmp.gt.f32.partialorder %v2248_v63, 0.0  ;;  %v897_v3 = vmul.f32 0.1, %v2248_v63  ;;  %vm890_vm0 = vcmp.gt.f32.partialorder %v2308_v38, 0.0 }
 0x4b8   :  { %v2253_v8 = vsel %vm889_vm2, %v2248_v63, %v897_v3  ;;  %vm93_vm2 = vcmp.lt.s32.totalorder %v89_v49, 128 }
 0x4b9   :  { %v843_v9 = vpop.f32.mrf.mxu2  ;;  %946 = vrot.lane.b32.xlu0 %v2253_v8, %s1552_s26  ;;  %v872_v12 = vpop.f32.mrf.mxu3 }
 0x4ba   :  { %v844_v6 = vadd.f32 %v843_v9, %v799_v4  ;;  %v873_v7 = vadd.f32 %v872_v12, %v799_v4 }
 0x4bc   :  { %v2258_v57 = vadd.f32 %v844_v6, %v1954_v62  ;;  %v2261_v54 = vadd.f32 %v873_v7, %v1957_v18  ;;  %v96_v7 = vadd.s32 4294967291, %v1679_v25 }
 0x4be   :  { %vm891_vm3 = vcmp.gt.f32.partialorder %v2258_v57, 0.0  ;;  %v899_v10 = vmul.f32 0.1, %v2258_v57  ;;  %vm892_vm4 = vcmp.gt.f32.partialorder %v2261_v54, 0.0  ;;  %v900_v14 = vmul.f32 0.1, %v2261_v54 }
 0x4c0   :  { %v2268_v16 = vsel %vm891_vm3, %v2258_v57, %v899_v10  ;;  %v2271_v19 = vsel %vm892_vm4, %v2261_v54, %v900_v14  ;;  %vm962_vm3 = vcmp.lt.s32.totalorder %v1679_v25, 123  ;;  %v97_v10 = vadd.s32 4294967291, %v1682_v28 }
 0x4c1   :  { %v846_v62 = vpop.f32.mrf.mxu2  ;;  %948 = vrot.lane.b32.xlu1 %v2268_v16, %s1552_s26  ;;  %v875_v18 = vpop.f32.mrf.mxu3  ;;  %956 = vrot.lane.b32.xlu2 %v2271_v19, %s1552_s26  ;;  %vm929_vm4 = vcmp.lt.s32.totalorder %v1679_v25, 5  ;;  %v1448_v25 = vld [vmem:[%s2568_s3 + $0x50] sm:$0xff] }
 0x4c2   :  { %v847_v20 = vadd.f32 %v846_v62, %v804_v15  ;;  %v876_v1 = vadd.f32 %v875_v18, %v804_v15 }
 0x4c4   :  { %v2278_v5 = vadd.f32 %v847_v20, %v1974_v11  ;;  %v2281_v21 = vadd.f32 %v876_v1, %v1977_v13 }
 0x4c6   :  { %vm894_vm5 = vcmp.gt.f32.partialorder %v2281_v21, 0.0  ;;  %v902_v26 = vmul.f32 0.1, %v2281_v21  ;;  %vm893_vm6 = vcmp.gt.f32.partialorder %v2278_v5, 0.0  ;;  %v901_v27 = vmul.f32 0.1, %v2278_v5 }
 0x4c8   :  { %v2288_v29 = vsel %vm894_vm5, %v2281_v21, %v902_v26  ;;  %v2291_v30 = vsel %vm893_vm6, %v2278_v5, %v901_v27  ;;  %vm98_vm5 = vcmp.ge.s32.totalorder %v96_v7, 0  ;;  %vm99_vm6 = vcmp.ge.s32.totalorder %v97_v10, 0 }
 0x4c9   :  { %v849_v33 = vpop.f32.mrf.mxu2  ;;  %v878_v11 = vpop.f32.mrf.mxu3  ;;  %958 = vrot.lane.b32.xlu0 %v2288_v29, %s1552_s26  ;;  %950 = vrot.lane.b32.xlu2 %v2291_v30, %s1552_s26 }
 0x4ca   :  { %v850_v13 = vadd.f32 %v849_v33, %v809_v56  ;;  %v879_v0 = vadd.f32 %v878_v11, %v809_v56  ;;  %v1415_v11 = vld [vmem:[%s2566_s1 + $0x48] sm:$0xff] }
 0x4cc   :  { %v2298_v36 = vadd.f32 %v850_v13, %v1994_v22  ;;  %v2301_v35 = vadd.f32 %v879_v0, %v1997_v24  ;;  %v898_v22 = vmul.f32 0.1, %v2308_v38  ;;  %v1416_v13 = vld [vmem:[%s2566_s1 + $0x50] sm:$0xff]  ;;  %v1417_v0 = vld [vmem:[%s2566_s1 + $0x58] sm:$0xff] }
 0x4ce   :  { %vm896_vm7 = vcmp.gt.f32.partialorder %v2301_v35, 0.0  ;;  %v904_v23 = vmul.f32 0.1, %v2301_v35  ;;  %vm895_vm15 = vcmp.gt.f32.partialorder %v2298_v36, 0.0  ;;  %v903_v37 = vmul.f32 0.1, %v2298_v36 }
 0x4cf   :  { %v906_v24 = vsel %vm890_vm0, %v2308_v38, %v898_v22 }
 0x4d0   :  { %v912_v39 = vsel %vm896_vm7, %v2301_v35, %v904_v23  ;;  %v911_v40 = vsel %vm895_vm15, %v2298_v36, %v903_v37 }
 0x4d1   :  { %960 = vrot.lane.b32.xlu1 %v912_v39, %s1552_s26  ;;  %952 = vrot.lane.b32.xlu0 %v911_v40, %s1552_s26 }
 0x4d2   :  { %925 = vrot.lane.b32.xlu2 %v2288_v29, %s1553_s27 }
 0x4d9   :  { %954 = vrot.lane.b32.xlu1 %v906_v24, %s1552_s26  ;;  %915 = vrot.lane.b32.xlu0 %v2268_v16, %s1553_s27 }
 0x4da   :  { %919 = vrot.lane.b32.xlu2 %v911_v40, %s1553_s27 }
 0x4e1   :  { %927 = vrot.lane.b32.xlu0 %v912_v39, %s1553_s27  ;;  %917 = vrot.lane.b32.xlu1 %v2291_v30, %s1553_s27 }
 0x4e2   :  { %913 = vrot.lane.b32.xlu2 %v2253_v8, %s1553_s27 }
 0x4e9   :  { %921 = vrot.lane.b32.xlu0 %v906_v24, %s1553_s27  ;;  %923 = vrot.lane.b32.xlu1 %v2271_v19, %s1553_s27 }
 0x4ea   :  { %1001 = vperm.xlu2 %1490, %v1420_v34  }
 0x4f1   :  { %996 = vperm.xlu0 %1491, %v1419_v41   ;;  %1006 = vperm.xlu1 %1489, %v1421_v42  }
 0x4f9   :  { %991 = vperm.xlu1 %1489, %v1418_v17  }
 0x51b   :  { %v957_v44 = vpop.permute.xlu2 %956 }
 0x523   :  { %v951_v47 = vpop.permute.xlu2 %950 }
 0x52b   :  { %v947_v43 = vpop.permute.xlu0 %946 }
 0x52c   :  { %v926_v60 = vpop.permute.xlu2 %925 }
 0x533   :  { %v949_v45 = vpop.permute.xlu1 %948 }
 0x534   :  { %v964_v61 = vsel %vm962_vm3, %v949_v45, %v957_v44  ;;  %v968_v3 = vsel %vm962_vm3, %v957_v44, %v949_v45  ;;  %v920_v14 = vpop.permute.xlu2 %919 }
 0x53b   :  { %v959_v46 = vpop.permute.xlu0 %958 }
 0x53c   :  { %v965_v58 = vsel %vm962_vm3, %v951_v47, %v959_v46  ;;  %v969_v59 = vsel %vm962_vm3, %v959_v46, %v951_v47  ;;  %v914_v27 = vpop.permute.xlu2 %913 }
 0x543   :  { %v961_v52 = vpop.permute.xlu1 %960  ;;  %v953_v53 = vpop.permute.xlu0 %952 }
 0x544   :  { %v966_v55 = vsel %vm962_vm3, %v953_v53, %v961_v52  ;;  %v970_v56 = vsel %vm962_vm3, %v961_v52, %v953_v53  ;;  %v1002_v48 = vpop.permute.xlu2 %1001 }
 0x545   :  { %1422 = vmatpush.msk.msra.mxu0 %vm92_vm1, %v966_v55  ;;  %1434 = vmatpush.msk.msra.mxu1 %vm93_vm2, %v970_v56 }
 0x547   :  { %1423 = vmatpush.msk.msra.mxu0 %vm92_vm1, %v965_v58  ;;  %1435 = vmatpush.msk.msra.mxu1 %vm93_vm2, %v969_v59 }
 0x549   :  { %1424 = vmatpush.msk.msra.mxu0 %vm92_vm1, %v964_v61  ;;  %1436 = vmatpush.msk.msra.mxu1 %vm93_vm2, %v968_v3 }
 0x54b   :  { %v955_v4 = vpop.permute.xlu1 %954  ;;  %v916_v9 = vpop.permute.xlu0 %915 }
 0x54c   :  { %v963_v12 = vsel %vm962_vm3, %v947_v43, %v955_v4  ;;  %v967_v6 = vsel %vm962_vm3, %v955_v4, %v947_v43 }
 0x54d   :  { %1425 = vmatpush.msk.msra.mxu0 %vm92_vm1, %v963_v12  ;;  %1437 = vmatpush.msk.msra.mxu1 %vm93_vm2, %v967_v6 }
 0x54f   :  { %1029 = vmatpush.msra.mxu0 %v911_v40  ;;  %1058 = vmatpush.msra.mxu1 %v912_v39 }
 0x551   :  { %1030 = vmatpush.msra.mxu0 %v2291_v30  ;;  %1059 = vmatpush.msra.mxu1 %v2288_v29  ;;  %v1414_v29 = vld [vmem:[%s2566_s1 + $0x40] sm:$0xff] }
 0x553   :  { %v918_v15 = vpop.permute.xlu1 %917  ;;  %1031 = vmatpush.msra.mxu0 %v2268_v16  ;;  %1060 = vmatpush.msra.mxu1 %v2271_v19  ;;  %v928_v62 = vpop.permute.xlu0 %927 }
 0x554   :  { %v933_v28 = vsel %vm929_vm4, %v920_v14, %v928_v62  ;;  %v937_v18 = vsel %vm929_vm4, %v928_v62, %v920_v14  ;;  %v932_v16 = vsel %vm929_vm4, %v918_v15, %v926_v60  ;;  %v936_v19 = vsel %vm929_vm4, %v926_v60, %v918_v15 }
 0x555   :  { %1032 = vmatpush.msra.mxu0 %v2253_v8  ;;  %1061 = vmatpush.msra.mxu1 %v906_v24 }
 0x557   :  { %1426 = vmatpush.msk.msra.mxu0 %vm98_vm5, %v937_v18  ;;  %1438 = vmatpush.msk.msra.mxu1 %vm99_vm6, %v933_v28  ;;  %v1451_v28 = vld [vmem:[%s2569_s4 + $0x48] sm:$0xff]  ;;  %v1452_v18 = vld [vmem:[%s2569_s4 + $0x50] sm:$0xff] }
 0x559   :  { %1427 = vmatpush.msk.msra.mxu0 %vm98_vm5, %v936_v19  ;;  %1439 = vmatpush.msk.msra.mxu1 %vm99_vm6, %v932_v16  ;;  %v1450_v16 = vld [vmem:[%s2569_s4 + $0x40] sm:$0xff]  ;;  %v1453_v19 = vld [vmem:[%s2569_s4 + $0x58] sm:$0xff] }
 0x55b   :  { %v924_v8 = vpop.permute.xlu1 %923  ;;  %v922_v20 = vpop.permute.xlu0 %921 }
 0x55c   :  { %v931_v1 = vsel %vm929_vm4, %v916_v9, %v924_v8  ;;  %v935_v26 = vsel %vm929_vm4, %v924_v8, %v916_v9  ;;  %v930_v30 = vsel %vm929_vm4, %v914_v27, %v922_v20  ;;  %v934_v33 = vsel %vm929_vm4, %v922_v20, %v914_v27 }
 0x55d   :  { %1428 = vmatpush.msk.msra.mxu0 %vm98_vm5, %v935_v26  ;;  %1440 = vmatpush.msk.msra.mxu1 %vm99_vm6, %v931_v1 }
 0x55f   :  { %1429 = vmatpush.msk.msra.mxu0 %vm98_vm5, %v934_v33  ;;  %1441 = vmatpush.msk.msra.mxu1 %vm99_vm6, %v930_v30 }
 0x560   :  { %1430 = vmatmul.msk.f32.vlgmr.msra.gmra.mxu0 %vm238_vm14, %v1414_v29  ;;  %1442 = vmatmul.msk.f32.vlgmr.msra.gmra.mxu1 %vm238_vm14, %v1414_v29 }
 0x563   :  { %v1007_v2 = vpop.permute.xlu1 %1006  ;;  %v997_v34 = vpop.permute.xlu0 %996 }
 0x568   :  { %1431 = vmatmul.msk.f32.gmra.mxu0 %vm238_vm14, %v1415_v11  ;;  %1443 = vmatmul.msk.f32.gmra.mxu1 %vm238_vm14, %v1415_v11 }
 0x56b   :  { %v992_v23 = vpop.permute.xlu1 %991 }
 0x570   :  { %1432 = vmatmul.msk.f32.gmra.mxu0 %vm238_vm14, %v1416_v13  ;;  %1444 = vmatmul.msk.f32.gmra.mxu1 %vm238_vm14, %v1416_v13 }
 0x578   :  { %1433 = vmatmul.msk.f32.gmra.mxu0 %vm238_vm14, %v1417_v0  ;;  %1445 = vmatmul.msk.f32.gmra.mxu1 %vm238_vm14, %v1417_v0 }
 0x5dd   :  { %v1038_v37 = vpop.f32.mrf.mxu0  ;;  %v1067_v39 = vpop.f32.mrf.mxu1 }
 0x5de   :  { %v1039_v40 = vadd.f32 %v1038_v37, %v992_v23  ;;  %v1068_v14 = vadd.f32 %v1067_v39, %v992_v23 }
 0x5e0   :  { %v1087_v22 = vmul.f32 0.1, %v1039_v40  ;;  %vm1079_vm7 = vcmp.gt.f32.partialorder %v1039_v40, 0.0  ;;  %v1088_v15 = vmul.f32 0.1, %v1068_v14  ;;  %vm1080_vm5 = vcmp.gt.f32.partialorder %v1068_v14, 0.0 }
 0x5e2   :  { %v2414_v24 = vsel %vm1079_vm7, %v1039_v40, %v1087_v22  ;;  %v1096_v62 = vsel %vm1080_vm5, %v1068_v14, %v1088_v15 }
 0x5e3   :  { %1135 = vrot.lane.b32.xlu2 %v2414_v24, %s1547_s0 }
 0x5e5   :  { %v1041_v41 = vpop.f32.mrf.mxu0  ;;  %v1070_v42 = vpop.f32.mrf.mxu1 }
 0x5e6   :  { %v1042_v17 = vadd.f32 %v1041_v41, %v997_v34  ;;  %v1071_v43 = vadd.f32 %v1070_v42, %v997_v34 }
 0x5e8   :  { %v1089_v44 = vmul.f32 0.1, %v1042_v17  ;;  %v1090_v45 = vmul.f32 0.1, %v1071_v43  ;;  %vm1082_vm15 = vcmp.gt.f32.partialorder %v1071_v43, 0.0  ;;  %vm1081_vm0 = vcmp.gt.f32.partialorder %v1042_v17, 0.0 }
 0x5ea   :  { %v2418_v46 = vsel %vm1082_vm15, %v1071_v43, %v1090_v45  ;;  %v2420_v47 = vsel %vm1081_vm0, %v1042_v17, %v1089_v44 }
 0x5eb   :  { %1145 = vrot.lane.b32.xlu1 %v2418_v46, %s1547_s0  ;;  %1137 = vrot.lane.b32.xlu0 %v2420_v47, %s1547_s0 }
 0x5ed   :  { %v1044_v49 = vpop.f32.mrf.mxu0  ;;  %v1073_v52 = vpop.f32.mrf.mxu1 }
 0x5ee   :  { %v1045_v53 = vadd.f32 %v1044_v49, %v1002_v48  ;;  %v1074_v55 = vadd.f32 %v1073_v52, %v1002_v48  ;;  %v1446_v49 = vld [vmem:[%s2568_s3 + $0x40] sm:$0xff] }
 0x5f0   :  { %v1091_v56 = vmul.f32 0.1, %v1045_v53  ;;  %v1092_v58 = vmul.f32 0.1, %v1074_v55  ;;  %vm1084_vm1 = vcmp.gt.f32.partialorder %v1074_v55, 0.0  ;;  %vm1083_vm2 = vcmp.gt.f32.partialorder %v1045_v53, 0.0 }
 0x5f2   :  { %v2426_v59 = vsel %vm1084_vm1, %v1074_v55, %v1092_v58  ;;  %v2428_v60 = vsel %vm1083_vm2, %v1045_v53, %v1091_v56  ;;  %v1447_v55 = vld [vmem:[%s2568_s3 + $0x48] sm:$0xff]  ;;  %s1554_s3 = smov [#allocation5]  }
 0x5f3   :  { %1147 = vrot.lane.b32.xlu2 %v2426_v59, %s1547_s0  ;;  %1139 = vrot.lane.b32.xlu1 %v2428_v60, %s1547_s0  ;;  %s1287_s8 = sshll.u32 %s1554_s3, 4  ;;  %s1288_s8 = int_to_ptr.vmem [resolvable:$true] %s1287_s8 }
 0x5f5   :  { %v1047_v61 = vpop.f32.mrf.mxu0  ;;  %v1076_v3 = vpop.f32.mrf.mxu1 }
 0x5f6   :  { %v1048_v4 = vadd.f32 %v1047_v61, %v1007_v2  ;;  %v1077_v9 = vadd.f32 %v1076_v3, %v1007_v2 }
 0x5f8   :  { %v1093_v12 = vmul.f32 0.1, %v1048_v4  ;;  %v1094_v6 = vmul.f32 0.1, %v1077_v9  ;;  %vm1085_vm3 = vcmp.gt.f32.partialorder %v1048_v4, 0.0  ;;  %vm1086_vm4 = vcmp.gt.f32.partialorder %v1077_v9, 0.0 }
 0x5fa   :  { %v1101_v7 = vsel %vm1085_vm3, %v1048_v4, %v1093_v12  ;;  %v1102_v10 = vsel %vm1086_vm4, %v1077_v9, %v1094_v6 }
 0x5fb   :  { %1141 = vrot.lane.b32.xlu2 %v1101_v7, %s1547_s0  ;;  %1115 = vrot.lane.b32.xlu1 %v2426_v59, %s1548_s25 }
 0x5fc   :  { %1149 = vrot.lane.b32.xlu0 %v1102_v10, %s1547_s0 }
 0x603   :  { %1109 = vrot.lane.b32.xlu1 %v1101_v7, %s1548_s25  ;;  %1105 = vrot.lane.b32.xlu2 %v2420_v47, %s1548_s25 }
 0x604   :  { %1143 = vrot.lane.b32.xlu0 %v1096_v62, %s1547_s0 }
 0x60b   :  { %1103 = vrot.lane.b32.xlu1 %v2414_v24, %s1548_s25  ;;  %1117 = vrot.lane.b32.xlu2 %v1102_v10, %s1548_s25 }
 0x60c   :  { %1107 = vrot.lane.b32.xlu0 %v2428_v60, %s1548_s25 }
 0x613   :  { %1184 = vperm.xlu1 %1489, %v1451_v28   ;;  %1111 = vrot.lane.b32.xlu2 %v1096_v62, %s1548_s25 }
 0x614   :  { %1113 = vrot.lane.b32.xlu0 %v2418_v46, %s1548_s25 }
 0x61b   :  { %1189 = vperm.xlu2 %1490, %v1452_v18  }
 0x61c   :  { %1179 = vperm.xlu0 %1491, %v1450_v16  }
 0x624   :  { %1194 = vperm.xlu0 %1491, %v1453_v19  }
 0x63d   :  { %v1136_v8 = vpop.permute.xlu2 %1135 }
 0x64d   :  { %v1148_v1 = vpop.permute.xlu2 %1147 }
 0x655   :  { %v1142_v29 = vpop.permute.xlu2 %1141 }
 0x65d   :  { %v1146_v20 = vpop.permute.xlu1 %1145  ;;  %v1138_v26 = vpop.permute.xlu0 %1137 }
 0x65e   :  { %v1152_v23 = vsel %vm193_vm8, %v1138_v26, %v1146_v20  ;;  %v1156_v37 = vsel %vm193_vm8, %v1146_v20, %v1138_v26  ;;  %v1106_v39 = vpop.permute.xlu2 %1105 }
 0x665   :  { %v1140_v27 = vpop.permute.xlu1 %1139 }
 0x666   :  { %v1153_v13 = vsel %vm193_vm8, %v1140_v27, %v1148_v1  ;;  %v1157_v0 = vsel %vm193_vm8, %v1148_v1, %v1140_v27  ;;  %v1118_v42 = vpop.permute.xlu2 %1117 }
 0x66d   :  { %v1116_v2 = vpop.permute.xlu1 %1115 }
 0x66e   :  { %v1150_v30 = vpop.permute.xlu0 %1149  ;;  %v1112_v48 = vpop.permute.xlu2 %1111 }
 0x66f   :  { %v1154_v33 = vsel %vm193_vm8, %v1142_v29, %v1150_v30  ;;  %v1158_v11 = vsel %vm193_vm8, %v1150_v30, %v1142_v29 }
 0x670   :  { %1454 = vmatpush.msk.msra.mxu2 %vm76_vm9, %v1154_v33  ;;  %1466 = vmatpush.msk.msra.mxu3 %vm77_vm10, %v1158_v11 }
 0x672   :  { %1455 = vmatpush.msk.msra.mxu2 %vm76_vm9, %v1153_v13  ;;  %1467 = vmatpush.msk.msra.mxu3 %vm77_vm10, %v1157_v0 }
 0x674   :  { %1456 = vmatpush.msk.msra.mxu2 %vm76_vm9, %v1152_v23  ;;  %1468 = vmatpush.msk.msra.mxu3 %vm77_vm10, %v1156_v37 }
 0x675   :  { %v1110_v41 = vpop.permute.xlu1 %1109 }
 0x676   :  { %v1144_v40 = vpop.permute.xlu0 %1143  ;;  %v1122_v31 = vsel %vm160_vm11, %v1110_v41, %v1118_v42  ;;  %v1126_v32 = vsel %vm160_vm11, %v1118_v42, %v1110_v41  ;;  %v1190_v15 = vpop.permute.xlu2 %1189 }
 0x677   :  { %v1151_v22 = vsel %vm193_vm8, %v1136_v8, %v1144_v40  ;;  %v1155_v34 = vsel %vm193_vm8, %v1144_v40, %v1136_v8 }
 0x678   :  { %1457 = vmatpush.msk.msra.mxu2 %vm76_vm9, %v1151_v22  ;;  %1469 = vmatpush.msk.msra.mxu3 %vm77_vm10, %v1155_v34 }
 0x67a   :  { %1217 = vmatpush.msra.mxu2 %v1101_v7  ;;  %1246 = vmatpush.msra.mxu3 %v1102_v10 }
 0x67c   :  { %1218 = vmatpush.msra.mxu2 %v2428_v60  ;;  %1247 = vmatpush.msra.mxu3 %v2426_v59 }
 0x67e   :  { %1219 = vmatpush.msra.mxu2 %v2420_v47  ;;  %1248 = vmatpush.msra.mxu3 %v2418_v46  ;;  %v1108_v17 = vpop.permute.xlu0 %1107 }
 0x67f   :  { %v1121_v43 = vsel %vm160_vm11, %v1108_v17, %v1116_v2  ;;  %v1125_v44 = vsel %vm160_vm11, %v1116_v2, %v1108_v17 }
 0x680   :  { %1220 = vmatpush.msra.mxu2 %v2414_v24  ;;  %1249 = vmatpush.msra.mxu3 %v1096_v62  ;;  %v1104_v24 = vpop.permute.xlu1 %1103 }
 0x681   :  { %v1119_v52 = vsel %vm160_vm11, %v1104_v24, %v1112_v48  ;;  %v1123_v53 = vsel %vm160_vm11, %v1112_v48, %v1104_v24 }
 0x682   :  { %1458 = vmatpush.msk.msra.mxu2 %vm114_vm12, %v1126_v32  ;;  %1470 = vmatpush.msk.msra.mxu3 %vm115_vm13, %v1122_v31 }
 0x684   :  { %1459 = vmatpush.msk.msra.mxu2 %vm114_vm12, %v1125_v44  ;;  %1471 = vmatpush.msk.msra.mxu3 %vm115_vm13, %v1121_v43 }
 0x686   :  { %v1114_v45 = vpop.permute.xlu0 %1113 }
 0x687   :  { %v1120_v46 = vsel %vm160_vm11, %v1106_v39, %v1114_v45  ;;  %v1124_v47 = vsel %vm160_vm11, %v1114_v45, %v1106_v39 }
 0x688   :  { %1460 = vmatpush.msk.msra.mxu2 %vm114_vm12, %v1124_v47  ;;  %1472 = vmatpush.msk.msra.mxu3 %vm115_vm13, %v1120_v46  ;;  %v1185_v4 = vpop.permute.xlu1 %1184 }
 0x68a   :  { %1461 = vmatpush.msk.msra.mxu2 %vm114_vm12, %v1123_v53  ;;  %1473 = vmatpush.msk.msra.mxu3 %vm115_vm13, %v1119_v52 }
 0x68b   :  { %1462 = vmatmul.msk.f32.vlgmr.msra.gmra.mxu2 %vm238_vm14, %v1446_v49  ;;  %1474 = vmatmul.msk.f32.vlgmr.msra.gmra.mxu3 %vm238_vm14, %v1446_v49 }
 0x68e   :  { %v1180_v51 = vpop.permute.xlu0 %1179 }
 0x693   :  { %1463 = vmatmul.msk.f32.gmra.mxu2 %vm238_vm14, %v1447_v55  ;;  %1475 = vmatmul.msk.f32.gmra.mxu3 %vm238_vm14, %v1447_v55 }
 0x696   :  { %v1195_v19 = vpop.permute.xlu0 %1194 }
 0x69b   :  { %1464 = vmatmul.msk.f32.gmra.mxu2 %vm238_vm14, %v1448_v25  ;;  %1476 = vmatmul.msk.f32.gmra.mxu3 %vm238_vm14, %v1448_v25 }
 0x6a3   :  { %1465 = vmatmul.msk.f32.gmra.mxu2 %vm238_vm14, %v1449_v50  ;;  %1477 = vmatmul.msk.f32.gmra.mxu3 %vm238_vm14, %v1449_v50 }
 0x70e   :  { %v1226_v56 = vpop.f32.mrf.mxu2  ;;  %v1255_v58 = vpop.f32.mrf.mxu3 }
 0x70f   :  { %v1227_v59 = vadd.f32 %v1226_v56, %v1180_v51  ;;  %v1256_v60 = vadd.f32 %v1255_v58, %v1180_v51 }
 0x711   :  { %v1267_v61 = vadd.f32 %v1227_v59, %v2248_v63  ;;  %v1268_v3 = vadd.f32 %v1256_v60, %v2308_v38 }
 0x713   :  { %1275 = vst [vmem:[#allocation5] sm:$0xff] %v1267_v61 }
 0x714   :  { %1276 = vst [vmem:[#allocation5 + $0x8] sm:$0xff] %v1268_v3 }
 0x716   :  { %v1229_v9 = vpop.f32.mrf.mxu2  ;;  %v1258_v12 = vpop.f32.mrf.mxu3 }
 0x717   :  { %v1230_v6 = vadd.f32 %v1229_v9, %v1185_v4  ;;  %v1259_v7 = vadd.f32 %v1258_v12, %v1185_v4 }
 0x719   :  { %v1269_v10 = vadd.f32 %v1230_v6, %v2258_v57  ;;  %v1270_v14 = vadd.f32 %v1259_v7, %v2261_v54 }
 0x71b   :  { %1277 = vst [vmem:[#allocation5 + $0x10] sm:$0xff] %v1269_v10 }
 0x71c   :  { %1278 = vst [vmem:[#allocation5 + $0x18] sm:$0xff] %v1270_v14 }
 0x71e   :  { %v1232_v62 = vpop.f32.mrf.mxu2  ;;  %v1261_v28 = vpop.f32.mrf.mxu3 }
 0x71f   :  { %v1233_v18 = vadd.f32 %v1232_v62, %v1190_v15  ;;  %v1262_v63 = vadd.f32 %v1261_v28, %v1190_v15 }
 0x721   :  { %v1271_v38 = vadd.f32 %v1233_v18, %v2278_v5  ;;  %v1272_v16 = vadd.f32 %v1262_v63, %v2281_v21 }
 0x723   :  { %1279 = vst [vmem:[#allocation5 + $0x20] sm:$0xff] %v1271_v38 }
 0x724   :  { %1280 = vst [vmem:[#allocation5 + $0x28] sm:$0xff] %v1272_v16 }
 0x726   :  { %v1235_v8 = vpop.f32.mrf.mxu2  ;;  %v1264_v20 = vpop.f32.mrf.mxu3 }
 0x727   :  { %v1236_v1 = vadd.f32 %v1235_v8, %v1195_v19  ;;  %v1265_v57 = vadd.f32 %v1264_v20, %v1195_v19 }
 0x729   :  { %v1273_v54 = vadd.f32 %v1236_v1, %v2298_v36  ;;  %v1274_v26 = vadd.f32 %v1265_v57, %v2301_v35 }
 0x72b   :  { %1281 = vst [vmem:[#allocation5 + $0x30] sm:$0xff] %v1273_v54 }
 0x72c   :  { %1282 = vst [vmem:[#allocation5 + $0x38] sm:$0xff] %v1274_v26 }
 0x72d   :  { %1295 = dma.vmem_to_hbm [thread:$0]  %s1288_s8, 1024, %s1290_s2, [#allocation4], %s1545_s23, %s1545_s23, %s1546_s24  }
 0x72e   :  { %1542 = dma.done.wait [#allocation4], 1024  }
 0x72f   :  { %1543 = vsyncadd [#allocation4], 4294966272 }
 0x730   :  { %1300 = vsyncpa [#allocation3], 1 }
 0x731   :  { %1301 = vsyncpa [#allocation4], 1 }

</bundles_post_ra>
